<compile_context>
chip_gen: v6e
topology: v6e:2x2x1
jax: 0.10.0
libtpu: 0.0.40
codegen_flags: <defaults>
</compile_context>

<pallas_src>
import functools

import numpy as np

import jax
import jax.numpy as jnp
from jax import lax
from jax.experimental import pallas as pl
from jax.experimental.pallas import tpu as pltpu

POOL_K = 5
POOL_S = 3
HIDDEN_BLOCKS = 8      # total hidden (f1-output) blocks; w1 DMA pipelines across them
CORE_SPLIT = 2         # outer "parallel" grid axis (v7x: one per TensorCore)


def _pool_matrix(n, h, w, ho, wo):
    """AvgPool2d(5, stride=3) as a matmul: P @ x_nhwc_flat.

    Row order is spatial-major: row = p*n + b (p = i*wo + j); column = b*h*w + q.
    Built with numpy at trace time -> compile-time constant, stored bf16.
    """
    mat = np.zeros((ho * wo * n, n * h * w), np.float32)
    inv = 1.0 / float(POOL_K * POOL_K)
    for i in range(ho):
        for j in range(wo):
            sp = i * wo + j
            for b in range(n):
                for dy in range(POOL_K):
                    for dx in range(POOL_K):
                        q = (i * POOL_S + dy) * w + (j * POOL_S + dx)
                        mat[sp * n + b, b * h * w + q] = inv
    return jnp.asarray(mat).astype(jnp.bfloat16)


def inception_aux_kernel(x_ref, pool_ref, cw_ref, cb_ref, w1_ref, b1_ref, w2_ref,
                         b2_ref, out_ref, z_scr, *, n_batch, howo):
    """Fused avgpool -> 1x1 conv+ReLU -> f1+ReLU -> f2(+bias), accumulated over hidden blocks.

    Grid = (CORE_SPLIT, HIDDEN_BLOCKS // CORE_SPLIT), semantics ("parallel", "arbitrary").
    Hidden block index for step (c, k) is c*inner + k (encoded in the BlockSpec index maps).

      x_ref    : (N*H*W, Cin)     bf16  NHWC-flattened input        (constant block)
      pool_ref : (howo*N, N*H*W)  bf16  pooling matrix              (constant block)
      cw_ref   : (Cin, 128)       bf16  1x1 conv weight (transposed)
      cb_ref   : (1, 128)         f32
      w1_ref   : (hblk, howo*128) bf16  f1 weight rows for this hidden block
      b1_ref   : (1, hblk)        f32
      w2_ref   : (c_pad, hblk)    bf16  f2 weight columns for this hidden block
      b2_ref   : (1, c_pad)       f32
      out_ref  : (1, N, c_pad)    f32   per-c logits accumulator (resident over k)
      z_scr    : (N, howo*128)    bf16  cached conv output, flattened in torch (C,H,W) order
    """
    c = pl.program_id(0)
    k = pl.program_id(1)
    c_out = cw_ref.shape[1]

    @pl.when(k == 0)
    def _():
        # AvgPool2d(5, stride=3) as a single MXU matmul with a constant pooling matrix.
        pooled = jnp.dot(pool_ref[...], x_ref[...],
                         preferred_element_type=jnp.float32)           # (howo*N, Cin)
        # 1x1 conv over channels + bias + ReLU.
        z = jnp.dot(pooled.astype(jnp.bfloat16), cw_ref[...],
                    preferred_element_type=jnp.float32) + cb_ref[...]   # (howo*N, 128)
        z = jnp.maximum(z, 0.0)
        # Lay z out as (N, howo*128) so f1 is one K=2048 contraction
        # (16 tiny lane-aligned copies, executed only once per core).
        for p in range(howo):
            z_scr[:, p * c_out:(p + 1) * c_out] = (
                z[p * n_batch:(p + 1) * n_batch, :].astype(jnp.bfloat16))
        # Init this core's logits accumulator; fold the f2 bias into the c == 0 block.
        init = b2_ref[...] * (c == 0).astype(jnp.float32)               # (1, c_pad)
        out_ref[...] = jnp.broadcast_to(init[None], out_ref.shape)

    # TODO(synk): F.dropout(0.5) (both occurrences) is identity here (eval / inference mode).

    # f1 hidden block: single (N, 2048) x (hblk, 2048)^T bf16 matmul, f32 accumulation.
    h = jnp.einsum("nd,kd->nk", z_scr[...], w1_ref[...],
                   preferred_element_type=jnp.float32)
    h = jnp.maximum(h + b1_ref[...], 0.0).astype(jnp.bfloat16)          # (N, hblk)

    # f2 partial logits for this hidden block (class rows padded to a multiple of 16).
    part = jnp.einsum("nk,ck->nc", h, w2_ref[...],
                      preferred_element_type=jnp.float32)               # (N, c_pad)
    out_ref[...] += part[None]


def prepare_params(params, howo):
    """One-time (off hot path) conversion of PyTorch-layout params to kernel layout."""
    c_out, c_in = params["conv_w"].shape[:2]
    k1, f_in = params["f1_w"].shape
    assert f_in == c_out * howo
    nc = params["f2_w"].shape[0]
    c_pad = max(16, -(-nc // 16) * 16)    # pad class ROWS to a multiple of 16 (bf16 sublanes)

    cw = params["conv_w"].reshape(c_out, c_in).T.astype(jnp.bfloat16)       # (Cin, 128)
    cb = params["conv_b"].reshape(1, c_out).astype(jnp.float32)

    # f1 weight stored (k1, howo*c_out) with column order (spatial p, channel c), matching
    # the kernel's z layout; equivalent to torch.flatten's (C, H, W) order c*howo + p.
    # Row-blocked per hidden block -> each grid step DMAs a contiguous (hblk, 2048) slab.
    w1 = params["f1_w"].reshape(k1, c_out, howo).transpose(0, 2, 1)          # (k, p, c)
    w1 = w1.reshape(k1, howo * c_out).astype(jnp.bfloat16)                   # (1024, 2048)
    b1 = params["f1_b"].reshape(1, k1).astype(jnp.float32)

    # f2 kept in PyTorch (classes, k1) layout, class rows padded to c_pad, bf16.
    w2 = jnp.zeros((c_pad, k1), jnp.bfloat16).at[:nc, :].set(
        params["f2_w"].astype(jnp.bfloat16))
    b2 = jnp.zeros((1, c_pad), jnp.float32).at[0, :nc].set(params["f2_b"])

    return {"conv_w": cw, "conv_b": cb, "w1": w1, "b1": b1, "w2": w2, "b2": b2}


def inception_aux_forward(x_nchw, prep, *, num_classes):
    N, c_in, H, W = x_nchw.shape
    ho = (H - POOL_K) // POOL_S + 1
    wo = (W - POOL_K) // POOL_S + 1
    howo = ho * wo
    c_out = prep["conv_w"].shape[1]
    k1 = prep["w1"].shape[0]
    c_pad = prep["w2"].shape[0]
    assert prep["w1"].shape[1] == howo * c_out, "f1 expects 2048 features (128*4*4)"
    assert k1 % HIDDEN_BLOCKS == 0 and HIDDEN_BLOCKS % CORE_SPLIT == 0
    hblk = k1 // HIDDEN_BLOCKS
    inner = HIDDEN_BLOCKS // CORE_SPLIT

    # NCHW -> NHWC-flat (channels land on lanes), bf16 (f32 accumulation on the MXU).
    x2d = jnp.transpose(x_nchw, (0, 2, 3, 1)).reshape(N * H * W, c_in).astype(jnp.bfloat16)
    pool_mat = _pool_matrix(N, H, W, ho, wo)        # compile-time constant
    # TODO(synk): pool_mat is O(N^2 * H*W); make it batch-independent before using
    # large batch sizes (fine at the small N used here).

    kernel = functools.partial(inception_aux_kernel, n_batch=N, howo=howo)

    partials = pl.pallas_call(
        kernel,
        out_shape=jax.ShapeDtypeStruct((CORE_SPLIT, N, c_pad), jnp.float32),
        grid=(CORE_SPLIT, inner),
        in_specs=[
            pl.BlockSpec((N * H * W, c_in), lambda c, k: (0, 0)),
            pl.BlockSpec((howo * N, N * H * W), lambda c, k: (0, 0)),
            pl.BlockSpec((c_in, c_out), lambda c, k: (0, 0)),
            pl.BlockSpec((1, c_out), lambda c, k: (0, 0)),
            pl.BlockSpec((hblk, howo * c_out), lambda c, k: (c * inner + k, 0)),
            pl.BlockSpec((1, hblk), lambda c, k: (0, c * inner + k)),
            pl.BlockSpec((c_pad, hblk), lambda c, k: (0, c * inner + k)),
            pl.BlockSpec((1, c_pad), lambda c, k: (0, 0)),
        ],
        out_specs=pl.BlockSpec((1, N, c_pad), lambda c, k: (c, 0, 0)),
        scratch_shapes=[pltpu.VMEM((N, howo * c_out), jnp.bfloat16)],
        compiler_params=pltpu.CompilerParams(
            dimension_semantics=("parallel", "arbitrary")),
    )(x2d, pool_mat, prep["conv_w"], prep["conv_b"], prep["w1"], prep["b1"],
      prep["w2"], prep["b2"])

    # f2 bias is already folded into the c == 0 partial inside the kernel.
    logits = partials.sum(axis=0)
    return logits[:, :num_classes]


def reference_forward(x_nchw, params):
    """Pure-JAX f32 reference (matches PyTorch eval-mode semantics)."""
    N, c_in, _, _ = x_nchw.shape
    pooled = lax.reduce_window(x_nchw, 0.0, lax.add,
                               (1, 1, POOL_K, POOL_K),
                               (1, 1, POOL_S, POOL_S), "VALID") / (POOL_K * POOL_K)
    w = params["conv_w"].reshape(128, c_in)
    conv = jnp.einsum("oc,nchw->nohw", w, pooled) + params["conv_b"][None, :, None, None]
    conv = jnp.maximum(conv, 0.0)
    flat = conv.reshape(N, -1)
    h = jnp.maximum(flat @ params["f1_w"].T + params["f1_b"], 0.0)
    return h @ params["f2_w"].T + params["f2_b"]


def init_params(key, in_channels, num_classes):
    ks = jax.random.split(key, 6)
    return {
        "conv_w": 0.1 * jax.random.normal(ks[0], (128, in_channels, 1, 1), jnp.float32),
        "conv_b": 0.1 * jax.random.normal(ks[1], (128,), jnp.float32),
        "f1_w": 0.02 * jax.random.normal(ks[2], (1024, 2048), jnp.float32),
        "f1_b": 0.02 * jax.random.normal(ks[3], (1024,), jnp.float32),
        "f2_w": 0.02 * jax.random.normal(ks[4], (10, 1024), jnp.float32),
        "f2_b": 0.02 * jax.random.normal(ks[5], (10,), jnp.float32),
    }


if __name__ == "__main__":
    key = jax.random.PRNGKey(0)
    k_x, k_p = jax.random.split(key)

    # avgpool(5, stride=3) on 14x14 -> 4x4; 128 channels * 4 * 4 = 2048 = f1 input.
    N, C_IN, H, W = 2, 8, 14, 14
    NUM_CLASSES = 10

    x = jax.random.normal(k_x, (N, C_IN, H, W), jnp.float32)
    params = init_params(k_p, C_IN, NUM_CLASSES)

    ho = (H - POOL_K) // POOL_S + 1
    wo = (W - POOL_K) // POOL_S + 1
    prep = prepare_params(params, ho * wo)        # one-time layout / bf16 / pad prep

    fwd = jax.jit(inception_aux_forward, static_argnames=("num_classes",))
    out = fwd(x, prep, num_classes=NUM_CLASSES)
    out = jax.block_until_ready(out)

    ref = reference_forward(x, params)
    assert out.shape == (N, NUM_CLASSES)
    max_err = float(jnp.max(jnp.abs(out - ref)))
    # pool/conv/f1/f2 all run with bf16 operands (f32 MXU accumulation), so tolerance is
    # looser than pure f32.
    assert jnp.allclose(out, ref, atol=3e-2, rtol=3e-2), f"mismatch vs reference: {max_err}"

    print("KERNEL_OK")
</pallas_src>

<mosaic_0001>
module attributes {stable_mosaic.version = 11 : i64} {
  func.func @inception_aux_kernel(%arg0: i32, %arg1: i32, %arg2: memref<392x8xbf16, #tpu.memory_space<vmem>>, %arg3: memref<32x392xbf16, #tpu.memory_space<vmem>>, %arg4: memref<8x128xbf16, #tpu.memory_space<vmem>>, %arg5: memref<1x128xf32, #tpu.memory_space<vmem>>, %arg6: memref<128x2048xbf16, #tpu.memory_space<vmem>>, %arg7: memref<1x128xf32, #tpu.memory_space<vmem>>, %arg8: memref<16x128xbf16, #tpu.memory_space<vmem>>, %arg9: memref<1x16xf32, #tpu.memory_space<vmem>>, %arg10: memref<1x2x16xf32, #tpu.memory_space<vmem>>, %arg11: memref<2x2048xbf16, #tpu.memory_space<vmem>>) attributes {dimension_semantics = [#tpu.dimension_semantics<parallel>, #tpu.dimension_semantics<arbitrary>], iteration_bounds = array<i64: 2, 4>, scalar_prefetch = 0 : i64, scratch_operands = 1 : i64, tpu.core_type = #tpu.core_type<tc>, window_params = [{pipeline_mode = #tpu.pipeline_mode<synchronous>, transform_indices = @transform_0, window_bounds = array<i64: 392, 8>}, {pipeline_mode = #tpu.pipeline_mode<synchronous>, transform_indices = @transform_1, window_bounds = array<i64: 32, 392>}, {pipeline_mode = #tpu.pipeline_mode<synchronous>, transform_indices = @transform_2, window_bounds = array<i64: 8, 128>}, {pipeline_mode = #tpu.pipeline_mode<synchronous>, transform_indices = @transform_3, window_bounds = array<i64: 1, 128>}, {transform_indices = @transform_4, window_bounds = array<i64: 128, 2048>}, {transform_indices = @transform_5, window_bounds = array<i64: 1, 128>}, {transform_indices = @transform_6, window_bounds = array<i64: 16, 128>}, {pipeline_mode = #tpu.pipeline_mode<synchronous>, transform_indices = @transform_7, window_bounds = array<i64: 1, 16>}, {transform_indices = @transform_8, window_bounds = array<i64: 1, 2, 16>}]} {
    %c0_i32 = arith.constant 0 : i32
    %0 = arith.cmpi eq, %arg1, %c0_i32 : i32
    %1 = arith.extui %0 : i1 to i32
    %c0_i32_0 = arith.constant 0 : i32
    %2 = arith.cmpi ne, %1, %c0_i32_0 : i32
    scf.if %2 {
      %c0_16 = arith.constant 0 : index
      %c0_17 = arith.constant 0 : index
      %18 = vector.load %arg3[%c0_16, %c0_17] : memref<32x392xbf16, #tpu.memory_space<vmem>>, vector<32x392xbf16>
      %c0_18 = arith.constant 0 : index
      %c0_19 = arith.constant 0 : index
      %19 = vector.load %arg2[%c0_18, %c0_19] : memref<392x8xbf16, #tpu.memory_space<vmem>>, vector<392x8xbf16>
      %cst_20 = arith.constant dense<0.000000e+00> : vector<32x8xf32>
      %20 = tpu.matmul %18, %19, %cst_20 {dimension_numbers = #tpu.dot_dimension_numbers<[1], [0], [0], [1], [0, 0, 1, 1], [], []>} : vector<32x392xbf16>, vector<392x8xbf16>, vector<32x8xf32> -> vector<32x8xf32>
      %21 = arith.truncf %20 : vector<32x8xf32> to vector<32x8xbf16>
      %c0_21 = arith.constant 0 : index
      %c0_22 = arith.constant 0 : index
      %22 = vector.load %arg4[%c0_21, %c0_22] : memref<8x128xbf16, #tpu.memory_space<vmem>>, vector<8x128xbf16>
      %cst_23 = arith.constant dense<0.000000e+00> : vector<32x128xf32>
      %23 = tpu.matmul %21, %22, %cst_23 {dimension_numbers = #tpu.dot_dimension_numbers<[1], [0], [0], [1], [0, 0, 1, 1], [], []>} : vector<32x8xbf16>, vector<8x128xbf16>, vector<32x128xf32> -> vector<32x128xf32>
      %c0_24 = arith.constant 0 : index
      %c0_25 = arith.constant 0 : index
      %24 = vector.load %arg5[%c0_24, %c0_25] : memref<1x128xf32, #tpu.memory_space<vmem>>, vector<1x128xf32>
      %25 = vector.broadcast %24 : vector<1x128xf32> to vector<32x128xf32>
      %26 = arith.addf %23, %25 : vector<32x128xf32>
      %cst_26 = arith.constant 0.000000e+00 : f32
      %27 = vector.broadcast %cst_26 : f32 to vector<32x128xf32>
      %28 = arith.maximumf %26, %27 : vector<32x128xf32>
      %29 = vector.extract_strided_slice %28 {offsets = [0, 0], sizes = [2, 128], strides = [1, 1]} : vector<32x128xf32> to vector<2x128xf32>
      %30 = arith.truncf %29 : vector<2x128xf32> to vector<2x128xbf16>
      %c0_27 = arith.constant 0 : index
      %c0_28 = arith.constant 0 : index
      %31 = vector.load %arg11[%c0_27, %c0_28] : memref<2x2048xbf16, #tpu.memory_space<vmem>>, vector<2x128xbf16>
      tpu.vector_store %arg11[%c0_27, %c0_28], %30 {strides = array<i32>} : memref<2x2048xbf16, #tpu.memory_space<vmem>>, vector<2x128xbf16>,
      %32 = vector.extract_strided_slice %28 {offsets = [2, 0], sizes = [2, 128], strides = [1, 1]} : vector<32x128xf32> to vector<2x128xf32>
      %33 = arith.truncf %32 : vector<2x128xf32> to vector<2x128xbf16>
      %c0_29 = arith.constant 0 : index
      %c128 = arith.constant 128 : index
      %34 = vector.load %arg11[%c0_29, %c128] : memref<2x2048xbf16, #tpu.memory_space<vmem>>, vector<2x128xbf16>
      tpu.vector_store %arg11[%c0_29, %c128], %33 {strides = array<i32>} : memref<2x2048xbf16, #tpu.memory_space<vmem>>, vector<2x128xbf16>,
      %35 = vector.extract_strided_slice %28 {offsets = [4, 0], sizes = [2, 128], strides = [1, 1]} : vector<32x128xf32> to vector<2x128xf32>
      %36 = arith.truncf %35 : vector<2x128xf32> to vector<2x128xbf16>
      %c0_30 = arith.constant 0 : index
      %c256 = arith.constant 256 : index
      %37 = vector.load %arg11[%c0_30, %c256] : memref<2x2048xbf16, #tpu.memory_space<vmem>>, vector<2x128xbf16>
      tpu.vector_store %arg11[%c0_30, %c256], %36 {strides = array<i32>} : memref<2x2048xbf16, #tpu.memory_space<vmem>>, vector<2x128xbf16>,
      %38 = vector.extract_strided_slice %28 {offsets = [6, 0], sizes = [2, 128], strides = [1, 1]} : vector<32x128xf32> to vector<2x128xf32>
      %39 = arith.truncf %38 : vector<2x128xf32> to vector<2x128xbf16>
      %c0_31 = arith.constant 0 : index
      %c384 = arith.constant 384 : index
      %40 = vector.load %arg11[%c0_31, %c384] : memref<2x2048xbf16, #tpu.memory_space<vmem>>, vector<2x128xbf16>
      tpu.vector_store %arg11[%c0_31, %c384], %39 {strides = array<i32>} : memref<2x2048xbf16, #tpu.memory_space<vmem>>, vector<2x128xbf16>,
      %41 = vector.extract_strided_slice %28 {offsets = [8, 0], sizes = [2, 128], strides = [1, 1]} : vector<32x128xf32> to vector<2x128xf32>
      %42 = arith.truncf %41 : vector<2x128xf32> to vector<2x128xbf16>
      %c0_32 = arith.constant 0 : index
      %c512 = arith.constant 512 : index
      %43 = vector.load %arg11[%c0_32, %c512] : memref<2x2048xbf16, #tpu.memory_space<vmem>>, vector<2x128xbf16>
      tpu.vector_store %arg11[%c0_32, %c512], %42 {strides = array<i32>} : memref<2x2048xbf16, #tpu.memory_space<vmem>>, vector<2x128xbf16>,
      %44 = vector.extract_strided_slice %28 {offsets = [10, 0], sizes = [2, 128], strides = [1, 1]} : vector<32x128xf32> to vector<2x128xf32>
      %45 = arith.truncf %44 : vector<2x128xf32> to vector<2x128xbf16>
      %c0_33 = arith.constant 0 : index
      %c640 = arith.constant 640 : index
      %46 = vector.load %arg11[%c0_33, %c640] : memref<2x2048xbf16, #tpu.memory_space<vmem>>, vector<2x128xbf16>
      tpu.vector_store %arg11[%c0_33, %c640], %45 {strides = array<i32>} : memref<2x2048xbf16, #tpu.memory_space<vmem>>, vector<2x128xbf16>,
      %47 = vector.extract_strided_slice %28 {offsets = [12, 0], sizes = [2, 128], strides = [1, 1]} : vector<32x128xf32> to vector<2x128xf32>
      %48 = arith.truncf %47 : vector<2x128xf32> to vector<2x128xbf16>
      %c0_34 = arith.constant 0 : index
      %c768 = arith.constant 768 : index
      %49 = vector.load %arg11[%c0_34, %c768] : memref<2x2048xbf16, #tpu.memory_space<vmem>>, vector<2x128xbf16>
      tpu.vector_store %arg11[%c0_34, %c768], %48 {strides = array<i32>} : memref<2x2048xbf16, #tpu.memory_space<vmem>>, vector<2x128xbf16>,
      %50 = vector.extract_strided_slice %28 {offsets = [14, 0], sizes = [2, 128], strides = [1, 1]} : vector<32x128xf32> to vector<2x128xf32>
      %51 = arith.truncf %50 : vector<2x128xf32> to vector<2x128xbf16>
      %c0_35 = arith.constant 0 : index
      %c896 = arith.constant 896 : index
      %52 = vector.load %arg11[%c0_35, %c896] : memref<2x2048xbf16, #tpu.memory_space<vmem>>, vector<2x128xbf16>
      tpu.vector_store %arg11[%c0_35, %c896], %51 {strides = array<i32>} : memref<2x2048xbf16, #tpu.memory_space<vmem>>, vector<2x128xbf16>,
      %53 = vector.extract_strided_slice %28 {offsets = [16, 0], sizes = [2, 128], strides = [1, 1]} : vector<32x128xf32> to vector<2x128xf32>
      %54 = arith.truncf %53 : vector<2x128xf32> to vector<2x128xbf16>
      %c0_36 = arith.constant 0 : index
      %c1024 = arith.constant 1024 : index
      %55 = vector.load %arg11[%c0_36, %c1024] : memref<2x2048xbf16, #tpu.memory_space<vmem>>, vector<2x128xbf16>
      tpu.vector_store %arg11[%c0_36, %c1024], %54 {strides = array<i32>} : memref<2x2048xbf16, #tpu.memory_space<vmem>>, vector<2x128xbf16>,
      %56 = vector.extract_strided_slice %28 {offsets = [18, 0], sizes = [2, 128], strides = [1, 1]} : vector<32x128xf32> to vector<2x128xf32>
      %57 = arith.truncf %56 : vector<2x128xf32> to vector<2x128xbf16>
      %c0_37 = arith.constant 0 : index
      %c1152 = arith.constant 1152 : index
      %58 = vector.load %arg11[%c0_37, %c1152] : memref<2x2048xbf16, #tpu.memory_space<vmem>>, vector<2x128xbf16>
      tpu.vector_store %arg11[%c0_37, %c1152], %57 {strides = array<i32>} : memref<2x2048xbf16, #tpu.memory_space<vmem>>, vector<2x128xbf16>,
      %59 = vector.extract_strided_slice %28 {offsets = [20, 0], sizes = [2, 128], strides = [1, 1]} : vector<32x128xf32> to vector<2x128xf32>
      %60 = arith.truncf %59 : vector<2x128xf32> to vector<2x128xbf16>
      %c0_38 = arith.constant 0 : index
      %c1280 = arith.constant 1280 : index
      %61 = vector.load %arg11[%c0_38, %c1280] : memref<2x2048xbf16, #tpu.memory_space<vmem>>, vector<2x128xbf16>
      tpu.vector_store %arg11[%c0_38, %c1280], %60 {strides = array<i32>} : memref<2x2048xbf16, #tpu.memory_space<vmem>>, vector<2x128xbf16>,
      %62 = vector.extract_strided_slice %28 {offsets = [22, 0], sizes = [2, 128], strides = [1, 1]} : vector<32x128xf32> to vector<2x128xf32>
      %63 = arith.truncf %62 : vector<2x128xf32> to vector<2x128xbf16>
      %c0_39 = arith.constant 0 : index
      %c1408 = arith.constant 1408 : index
      %64 = vector.load %arg11[%c0_39, %c1408] : memref<2x2048xbf16, #tpu.memory_space<vmem>>, vector<2x128xbf16>
      tpu.vector_store %arg11[%c0_39, %c1408], %63 {strides = array<i32>} : memref<2x2048xbf16, #tpu.memory_space<vmem>>, vector<2x128xbf16>,
      %65 = vector.extract_strided_slice %28 {offsets = [24, 0], sizes = [2, 128], strides = [1, 1]} : vector<32x128xf32> to vector<2x128xf32>
      %66 = arith.truncf %65 : vector<2x128xf32> to vector<2x128xbf16>
      %c0_40 = arith.constant 0 : index
      %c1536 = arith.constant 1536 : index
      %67 = vector.load %arg11[%c0_40, %c1536] : memref<2x2048xbf16, #tpu.memory_space<vmem>>, vector<2x128xbf16>
      tpu.vector_store %arg11[%c0_40, %c1536], %66 {strides = array<i32>} : memref<2x2048xbf16, #tpu.memory_space<vmem>>, vector<2x128xbf16>,
      %68 = vector.extract_strided_slice %28 {offsets = [26, 0], sizes = [2, 128], strides = [1, 1]} : vector<32x128xf32> to vector<2x128xf32>
      %69 = arith.truncf %68 : vector<2x128xf32> to vector<2x128xbf16>
      %c0_41 = arith.constant 0 : index
      %c1664 = arith.constant 1664 : index
      %70 = vector.load %arg11[%c0_41, %c1664] : memref<2x2048xbf16, #tpu.memory_space<vmem>>, vector<2x128xbf16>
      tpu.vector_store %arg11[%c0_41, %c1664], %69 {strides = array<i32>} : memref<2x2048xbf16, #tpu.memory_space<vmem>>, vector<2x128xbf16>,
      %71 = vector.extract_strided_slice %28 {offsets = [28, 0], sizes = [2, 128], strides = [1, 1]} : vector<32x128xf32> to vector<2x128xf32>
      %72 = arith.truncf %71 : vector<2x128xf32> to vector<2x128xbf16>
      %c0_42 = arith.constant 0 : index
      %c1792 = arith.constant 1792 : index
      %73 = vector.load %arg11[%c0_42, %c1792] : memref<2x2048xbf16, #tpu.memory_space<vmem>>, vector<2x128xbf16>
      tpu.vector_store %arg11[%c0_42, %c1792], %72 {strides = array<i32>} : memref<2x2048xbf16, #tpu.memory_space<vmem>>, vector<2x128xbf16>,
      %74 = vector.extract_strided_slice %28 {offsets = [30, 0], sizes = [2, 128], strides = [1, 1]} : vector<32x128xf32> to vector<2x128xf32>
      %75 = arith.truncf %74 : vector<2x128xf32> to vector<2x128xbf16>
      %c0_43 = arith.constant 0 : index
      %c1920 = arith.constant 1920 : index
      %76 = vector.load %arg11[%c0_43, %c1920] : memref<2x2048xbf16, #tpu.memory_space<vmem>>, vector<2x128xbf16>
      tpu.vector_store %arg11[%c0_43, %c1920], %75 {strides = array<i32>} : memref<2x2048xbf16, #tpu.memory_space<vmem>>, vector<2x128xbf16>,
      %c0_44 = arith.constant 0 : index
      %c0_45 = arith.constant 0 : index
      %77 = vector.load %arg9[%c0_44, %c0_45] : memref<1x16xf32, #tpu.memory_space<vmem>>, vector<1x16xf32>
      %c0_i32_46 = arith.constant 0 : i32
      %78 = arith.cmpi eq, %arg0, %c0_i32_46 : i32
      %79 = arith.extui %78 : i1 to i32
      %80 = arith.sitofp %79 : i32 to f32
      %81 = vector.broadcast %80 : f32 to vector<1x16xf32>
      %82 = arith.mulf %77, %81 : vector<1x16xf32>
      %83 = vector.shape_cast %82 : vector<1x16xf32> to vector<1x1x16xf32>
      %84 = vector.shape_cast %83 : vector<1x1x16xf32> to vector<1x1x16xf32>
      %85 = vector.broadcast %84 : vector<1x1x16xf32> to vector<1x2x16xf32>
      %c0_47 = arith.constant 0 : index
      %c0_48 = arith.constant 0 : index
      %c0_49 = arith.constant 0 : index
      %86 = vector.load %arg10[%c0_47, %c0_48, %c0_49] : memref<1x2x16xf32, #tpu.memory_space<vmem>>, vector<1x2x16xf32>
      tpu.vector_store %arg10[%c0_47, %c0_48, %c0_49], %85 {strides = array<i32>} : memref<1x2x16xf32, #tpu.memory_space<vmem>>, vector<1x2x16xf32>,
    } else {
    }
    %c0 = arith.constant 0 : index
    %c0_1 = arith.constant 0 : index
    %3 = vector.load %arg11[%c0, %c0_1] : memref<2x2048xbf16, #tpu.memory_space<vmem>>, vector<2x2048xbf16>
    %c0_2 = arith.constant 0 : index
    %c0_3 = arith.constant 0 : index
    %4 = vector.load %arg6[%c0_2, %c0_3] : memref<128x2048xbf16, #tpu.memory_space<vmem>>, vector<128x2048xbf16>
    "tpu.trace_start"() <{level = 10 : i32, message = "nd,kd->nk"}> : () -> ()
    %cst = arith.constant dense<0.000000e+00> : vector<2x128xf32>
    %5 = tpu.matmul %3, %4, %cst {dimension_numbers = #tpu.dot_dimension_numbers<[1], [1], [0], [0], [0, 0, 1, 0], [], []>} : vector<2x2048xbf16>, vector<128x2048xbf16>, vector<2x128xf32> -> vector<2x128xf32>
    "tpu.trace_stop"() : () -> ()
    %c0_4 = arith.constant 0 : index
    %c0_5 = arith.constant 0 : index
    %6 = vector.load %arg7[%c0_4, %c0_5] : memref<1x128xf32, #tpu.memory_space<vmem>>, vector<1x128xf32>
    %7 = vector.broadcast %6 : vector<1x128xf32> to vector<2x128xf32>
    %8 = arith.addf %5, %7 : vector<2x128xf32>
    %cst_6 = arith.constant 0.000000e+00 : f32
    %9 = vector.broadcast %cst_6 : f32 to vector<2x128xf32>
    %10 = arith.maximumf %8, %9 : vector<2x128xf32>
    %11 = arith.truncf %10 : vector<2x128xf32> to vector<2x128xbf16>
    %c0_7 = arith.constant 0 : index
    %c0_8 = arith.constant 0 : index
    %12 = vector.load %arg8[%c0_7, %c0_8] : memref<16x128xbf16, #tpu.memory_space<vmem>>, vector<16x128xbf16>
    "tpu.trace_start"() <{level = 10 : i32, message = "nk,ck->nc"}> : () -> ()
    %cst_9 = arith.constant dense<0.000000e+00> : vector<2x16xf32>
    %13 = tpu.matmul %11, %12, %cst_9 {dimension_numbers = #tpu.dot_dimension_numbers<[1], [1], [0], [0], [0, 0, 1, 0], [], []>} : vector<2x128xbf16>, vector<16x128xbf16>, vector<2x16xf32> -> vector<2x16xf32>
    "tpu.trace_stop"() : () -> ()
    %c0_10 = arith.constant 0 : index
    %c0_11 = arith.constant 0 : index
    %c0_12 = arith.constant 0 : index
    %14 = vector.load %arg10[%c0_10, %c0_11, %c0_12] : memref<1x2x16xf32, #tpu.memory_space<vmem>>, vector<1x2x16xf32>
    %15 = vector.shape_cast %13 : vector<2x16xf32> to vector<1x2x16xf32>
    %16 = arith.addf %14, %15 : vector<1x2x16xf32>
    %c0_13 = arith.constant 0 : index
    %c0_14 = arith.constant 0 : index
    %c0_15 = arith.constant 0 : index
    %17 = vector.load %arg10[%c0_13, %c0_14, %c0_15] : memref<1x2x16xf32, #tpu.memory_space<vmem>>, vector<1x2x16xf32>
    tpu.vector_store %arg10[%c0_13, %c0_14, %c0_15], %16 {strides = array<i32>} : memref<1x2x16xf32, #tpu.memory_space<vmem>>, vector<1x2x16xf32>,
    return
  }
  func.func @transform_0(%arg0: i32, %arg1: i32) -> (i32, i32) {
    %c0_i32 = arith.constant 0 : i32
    %c0_i32_0 = arith.constant 0 : i32
    %c0_i32_1 = arith.constant 0 : i32
    return %c0_i32, %c0_i32_0 : i32, i32
  }
  func.func @transform_1(%arg0: i32, %arg1: i32) -> (i32, i32) {
    %c0_i32 = arith.constant 0 : i32
    %c0_i32_0 = arith.constant 0 : i32
    %c0_i32_1 = arith.constant 0 : i32
    return %c0_i32, %c0_i32_0 : i32, i32
  }
  func.func @transform_2(%arg0: i32, %arg1: i32) -> (i32, i32) {
    %c0_i32 = arith.constant 0 : i32
    %c0_i32_0 = arith.constant 0 : i32
    %c0_i32_1 = arith.constant 0 : i32
    return %c0_i32, %c0_i32_0 : i32, i32
  }
  func.func @transform_3(%arg0: i32, %arg1: i32) -> (i32, i32) {
    %c0_i32 = arith.constant 0 : i32
    %c0_i32_0 = arith.constant 0 : i32
    %c0_i32_1 = arith.constant 0 : i32
    return %c0_i32, %c0_i32_0 : i32, i32
  }
  func.func @transform_4(%arg0: i32, %arg1: i32) -> (i32, i32) {
    %c4_i32 = arith.constant 4 : i32
    %0 = arith.muli %arg0, %c4_i32 : i32
    %1 = arith.addi %0, %arg1 : i32
    %c0_i32 = arith.constant 0 : i32
    %c0_i32_0 = arith.constant 0 : i32
    return %1, %c0_i32 : i32, i32
  }
  func.func @transform_5(%arg0: i32, %arg1: i32) -> (i32, i32) {
    %c4_i32 = arith.constant 4 : i32
    %0 = arith.muli %arg0, %c4_i32 : i32
    %1 = arith.addi %0, %arg1 : i32
    %c0_i32 = arith.constant 0 : i32
    %c0_i32_0 = arith.constant 0 : i32
    return %c0_i32, %1 : i32, i32
  }
  func.func @transform_6(%arg0: i32, %arg1: i32) -> (i32, i32) {
    %c4_i32 = arith.constant 4 : i32
    %0 = arith.muli %arg0, %c4_i32 : i32
    %1 = arith.addi %0, %arg1 : i32
    %c0_i32 = arith.constant 0 : i32
    %c0_i32_0 = arith.constant 0 : i32
    return %c0_i32, %1 : i32, i32
  }
  func.func @transform_7(%arg0: i32, %arg1: i32) -> (i32, i32) {
    %c0_i32 = arith.constant 0 : i32
    %c0_i32_0 = arith.constant 0 : i32
    %c0_i32_1 = arith.constant 0 : i32
    return %c0_i32, %c0_i32_0 : i32, i32
  }
  func.func @transform_8(%arg0: i32, %arg1: i32) -> (i32, i32, i32) {
    %c0_i32 = arith.constant 0 : i32
    %c0_i32_0 = arith.constant 0 : i32
    %c0_i32_1 = arith.constant 0 : i32
    return %arg0, %c0_i32, %c0_i32_0 : i32, i32, i32
  }
}

</mosaic_0001>

<bundles_post_ra>
// kernel: inception_aux_forward.1
= control target key start
LH: loop header
LB: loop body
LE: loop exit
PB: predicated region body
PF: predicated region fallthrough
CT: control target
= control target key end

     0   :  { %s3778_s0 = inlined_call_operand.vmem [shape: bf16[392,8], index: 0, kind: input, shape index: {}]   ;;  %s3779_s1 = inlined_call_operand.hbm [shape: bf16[32,392], index: 1, kind: input, shape index: {}]   ;;  %s3780_s2 = inlined_call_operand.hbm [shape: bf16[8,128], index: 2, kind: input, shape index: {}]   ;;  %s3781_s3 = inlined_call_operand.hbm [shape: f32[1,128], index: 3, kind: input, shape index: {}]   ;;  %s3782_s4 = inlined_call_operand.hbm [shape: bf16[1024,2048], index: 4, kind: input, shape index: {}]   ;;  %s3783_s5 = inlined_call_operand.hbm [shape: f32[1,1024], index: 5, kind: input, shape index: {}]   ;;  %s3784_s6 = inlined_call_operand.hbm [shape: bf16[16,1024], index: 6, kind: input, shape index: {}]   ;;  %s3785_s7 = inlined_call_operand.hbm [shape: f32[1,16], index: 7, kind: input, shape index: {}]   ;;  %s3786_s8 = inlined_call_operand.vmem [shape: f32[2,2,16], index: 8, kind: output, shape index: {}]  }
   0x1   :  { %3797 = sst [smem:[#allocation25_spill]] %s3778_s0 }
   0x2   :  { %3798 = sst [smem:[#allocation26_spill]] %s3780_s2 }
   0x3   :  { %3799 = sst [smem:[#allocation27_spill]] %s3782_s4 }
   0x4   :  { %3800 = sst [smem:[#allocation28_spill]] %s3785_s7 }
   0x5   :  { %13 = vsyncpa [#allocation4], 0 }
   0x6   :  { %14 = vsyncpa [#allocation6], 0 }
   0x7   :  { %15 = vsyncpa [#allocation9], 0 }
   0x8   :  { %17 = vsyncpa [#allocation9 + $0x1], 0 }
   0x9   :  { %18 = vsyncpa [#allocation12], 0 }
   0xa   :  { %20 = vsyncpa [#allocation12 + $0x1], 0  ;;  %s3250_s27 = smov 0   ;;  %s3252_s28 = smov 0  }
   0xb   :  { %s3254_s29 = smov 0   ;;  %s3256_s30 = smov 0  }
   0xc   :  { %s3258_s9 = smov 0   ;;  %s3260_s10 = smov 0  }
   0xd   :  { %s3262_s11 = smov 0   ;;  %s3264_s12 = smov 0  }
   0xe LB: > { %3801 = sst [smem:[#allocation19_spill]] %s3169_s30  ;;  %s3790_s13 = sadd.s32 4294967295, %s3185_s12   ;;  %s3185_s12 = sphi %s3264_s12, %s26_s12   ;;  %s3181_s11 = sphi %s3262_s11, %s3829_s11   ;;  %s3177_s10 = sphi %s3260_s10, %s3828_s10   ;;  %s3173_s9 = sphi %s3258_s9, %s3833_s9   ;;  %s3169_s30 = sphi %s3256_s30, %s3826_s30   ;;  %s3165_s29 = sphi %s3254_s29, %s3832_s29   ;;  %s3161_s28 = sphi %s3252_s28, %s3831_s28   ;;  %s3157_s27 = sphi %s3250_s27, %s3830_s27  }
   0xf   : > { %3802 = sst [smem:[#allocation20_spill]] %s3177_s10  ;;  %p146_p0 = scmp.ne.s32.totalorder %s3161_s28, %s3157_s27 }
  0x10   : > { %3803 = sst [smem:[#allocation21_spill]] %s3181_s11  ;;  %p3292_p1 = scmp.eq.s32.totalorder %s3790_s13, 0 }
  0x11   : > { %p2495_p2 = scmp.ge.s32.totalorder %s3185_s12, 1  ;;  %p264_p3 = scmp.lt.s32.totalorder %s3185_s12, 9 }
  0x12   : > { %s3804_s14 = scalar_select %p3292_p1, 1, 0 }
  0x13   : > { %p3300_p4 = por %p3292_p1, %p146_p0  ;;  %p3304_p5 = pnand %p2495_p2, %p264_p3 }
  0x14   : > { %s3187_s17 = smov [#allocation5]   ;;  %s3188_s19 = smov [#allocation13]  }
  0x15   : > { %s3805_s15 = scalar_select %p3300_p4, 1, 0 }
  0x16   : > { %s293_s18 = sshll.u32 %s3187_s17, 4  ;;  %p2764_p6 = pneg %p3304_p5  ;;  %s294_s18 = int_to_ptr.vmem [resolvable:$true] %s293_s18 }
  0x17   : > { %s315_s20 = sshll.u32 %s3188_s19, 4  ;;  %s2926_s22 = scalar_lea.vmem %s294_s18, 64  ;;  %s316_s20 = int_to_ptr.vmem [resolvable:$true] %s315_s20 }
  0x18   : > { %p3312_p7 = pnand %p2764_p6, %p3292_p1  ;;  %p2927_p9 = scmp.ne.s32.totalorder %s294_s18, %s2926_s22 }
  0x19   : > { %p2934_p12 = scmp.lt.s32.totalorder %s294_s18, %s294_s18  ;;  %p2935_p13 = scmp.lt.s32.totalorder %s2926_s22, %s2926_s22 }
  0x1a   : > { %p2917_p8 = pneg %p3312_p7 }
  0x1b   : > { %p2936_p0 = por %p2935_p13, %p2934_p12 }
  0x1c   : > { %p2929_p10 = pnand %p2927_p9, %p2917_p8 }
  0x1e   : > { %p2930_p11 = pneg %p2929_p10 }
  0x20   : > { %p2937_p2 = pnand %p2936_p0, %p2930_p11 }
  0x22   : > { %2940 = shalt.err (!%p2937_p2)
}
  0x23   : > { %s3808_s2 = sld [smem:[#allocation26_spill]]  ;;  %s2952_s25 = scalar_lea.vmem %s316_s20, 16 }
  0x24   : > { %p2953_p3 = scmp.ne.s32.totalorder %s316_s20, %s2952_s25  ;;  %s2959_s26 = scalar_lea.vmem %s316_s20, 32 }
  0x25   : > { %p2960_p9 = scmp.lt.s32.totalorder %s316_s20, %s316_s20  ;;  %p2961_p10 = scmp.lt.s32.totalorder %s2959_s26, %s2952_s25 }
  0x26   : > { %p2955_p6 = pnand %p2953_p3, %p2917_p8 }
  0x27   : > { %p2962_p1 = por %p2961_p10, %p2960_p9 }
  0x28   : > { %p2956_p4 = pneg %p2955_p6 }
  0x29   : > { %2770 = dma.hbm_to_vmem [thread:$0]  (!%p3312_p7), %s3808_s2, 64, %s294_s18, [#allocation6]  }
  0x2a   : > { %p2963_p12 = pnand %p2962_p1, %p2956_p4 }
  0x2c   : > { %2966 = shalt.err (!%p2963_p12)
}
  0x2d   : > { %s3809_s7 = sld [smem:[#allocation28_spill]]  ;;  %s35_s18 = sadd.s32 1, %s3177_s10 }
  0x2e   : > { %s38_s19 = sadd.s32 1, %s3181_s11  ;;  %p36_p1 = scmp.ge.s32.totalorder %s35_s18, 4 }
  0x2f   : > { %s2489_s22 = sshll.u32 %s3181_s11, 2  ;;  %s133_s24 = sadd.s32 1, %s3165_s29 }
  0x30   : > { %s3338_s23 = sadd.s32 %s3177_s10, %s2489_s22  ;;  %s3835_s18 = smov (%p36_p1, %s35_s18), 0 }
  0x31   : > { %3810 = sst [smem:[#allocation22_spill]] %s3835_s18  ;;  %s3837_s19 = smov (!%p36_p1, %s38_s19), %s3181_s11 }
  0x32   : > { %p140_p4 = scmp.ne.s32.totalorder %s3165_s29, %s3161_s28  ;;  %p141_p11 = scmp.eq.s32.totalorder %s3185_s12, 0 }
  0x33   : > { %2776 = dma.hbm_to_vmem [thread:$0]  (!%p3312_p7), %s3809_s7, 16, %s316_s20, [#allocation12]  }
  0x34   : > { %p40_p13 = scmp.ge.s32.totalorder %s3837_s19, 2  ;;  %p2791_p0 = scmp.lt.s32.totalorder %s3185_s12, 8 }
  0x35   : > { %p3348_p2 = por %p141_p11, %p140_p4  ;;  %s3356_s26 = sand.u32 1, %s3165_s29  }
  0x36   : > { %s3839_s19 = smov (%p40_p13, %s3837_s19), 0  ;;  %s2501_s17 = sshll.u32 %s3356_s26, 10 }
  0x37   : > { %3812 = sst [smem:[#allocation23_spill]] %s3839_s19  ;;  %s2490_s27 = sshll.u32 %s3839_s19, 2 }
  0x38   : > { %s129_s22 = sadd.s32 %s2490_s27, %s3835_s18  ;;  %s2695_s2 = sshll.u32 %s3338_s23, 14 }
  0x39   : > { %s130_s13 = ssub.s32 %s3338_s23, %s129_s22  ;;  %s3813_s4 = sld [smem:[#allocation27_spill]] }
  0x3a   : > { %p131_p3 = scmp.eq.s32.totalorder %s130_s13, 0  ;;  %s330_s0 = scalar_lea.vmem [#allocation8], %s2501_s17 }
  0x3b   : > { %s340_s30 = sshll.u32 %s330_s0, 4  ;;  %p3370_p6 = pnand %p2791_p0, %p3348_p2  ;;  %s341_s30 = int_to_ptr.vmem [resolvable:$true] %s340_s30 }
  0x3c   : > { %s3375_s19 = scalar_select %p131_p3, %s3165_s29, %s133_s24  }
  0x3d   : > { %s3816_s27 = sand.u32 1, %s3185_s12   ;;  %p2969_p9 = pneg %p3370_p6 }
  0x3e   : > { %3815 = sst [smem:[#allocation24_spill]] %s3375_s19  ;;  %s3379_s22 = scalar_lea.sflag [#allocation9], %s3816_s27 }
  0x3f   : > { %s339_s10 = scalar_lea.hbm %s3813_s4, %s2695_s2  ;;  %s2980_s7 = scalar_lea.vmem %s341_s30, 16384 }
  0x40   : > { %p2981_p10 = scmp.ne.s32.totalorder %s341_s30, %s2980_s7  ;;  %s3189_s0 = smov [#allocation8]  }
  0x41   : > { %s2985_s2 = sshll.u32 %s3189_s0, 4  ;;  %s2986_s2 = int_to_ptr.vmem [resolvable:$false] %s2985_s2 }
  0x42   : > { %p2983_p12 = pnand %p2981_p10, %p2969_p9  ;;  %s2987_s11 = scalar_lea.vmem %s2986_s2, 32768 }
  0x43   : > { %p2988_p4 = scmp.lt.s32.totalorder %s341_s30, %s2986_s2  ;;  %p2989_p11 = scmp.lt.s32.totalorder %s2987_s11, %s2980_s7 }
  0x44   : > { %p2984_p1 = pneg %p2983_p12 }
  0x45   : > { %p2990_p13 = por %p2989_p11, %p2988_p4 }
  0x47   : > { %p2991_p0 = pnand %p2990_p13, %p2984_p1 }
  0x49   : > { %2994 = shalt.err (!%p2991_p0)
}
  0x4a   : > { %s3190_s13 = smov 1024   ;;  %s3795_s24 = smov 64  }
  0x4b   : > { %2780 = dma.hbm_to_vmem [thread:$0]  (!%p3370_p6), %s339_s10, 16384, %s341_s30, %s3379_s22, %s3190_s13, %s3190_s13, %s3795_s24  }
  0x4c   : > { %s2508_s20 = sshll.u32 %s3356_s26, 3  ;;  %s3192_s0 = smov [#allocation3]  }
  0x4d   : > { %s373_s17 = scalar_lea.vmem [#allocation11], %s2508_s20  ;;  %s279_s2 = sshll.u32 %s3192_s0, 4  ;;  %s280_s2 = int_to_ptr.vmem [resolvable:$true] %s279_s2 }
  0x4e   : > { %s381_s27 = sshll.u32 %s373_s17, 4  ;;  %s3006_s7 = scalar_lea.vmem %s280_s2, 1024  ;;  %s3391_s27 = int_to_ptr.vmem [resolvable:$true] %s381_s27 }
  0x4f   : > { %p3007_p2 = scmp.ne.s32.totalorder %s280_s2, %s3006_s7  ;;  %p3014_p12 = scmp.lt.s32.totalorder %s280_s2, %s280_s2 }
  0x50   : > { %p3015_p1 = scmp.lt.s32.totalorder %s3006_s7, %s3006_s7 }
  0x51   : > { %p3009_p3 = pnand %p3007_p2, %p2917_p8 }
  0x52   : > { %p3016_p4 = por %p3015_p1, %p3014_p12 }
  0x53   : > { %p3010_p10 = pneg %p3009_p3 }
  0x55   : > { %p3017_p11 = pnand %p3016_p4, %p3010_p10 }
  0x57   : > { %3020 = shalt.err (!%p3017_p11)
}
  0x58   : > { %s3193_s30 = smov 256   ;;  %s3194_s10 = smov 16  }
  0x59   : > { %2767 = dma.hbm_to_vmem [thread:$0]  (!%p3312_p7), %s3779_s1, 1024, %s280_s2, [#allocation4], %s3193_s30, %s3193_s30, %s3194_s10  }
  0x5a   : > { %s3195_s20 = smov [#allocation7]   ;;  %s2507_s0 = sshll.u32 %s3338_s23, 4 }
  0x5b   : > { %s304_s17 = sshll.u32 %s3195_s20, 4  ;;  %s3405_s7 = scalar_lea.hbm %s3783_s5, %s2507_s0  ;;  %s305_s17 = int_to_ptr.vmem [resolvable:$true] %s304_s17 }
  0x5c   : > { %s3032_s18 = scalar_lea.vmem %s305_s17, 16  ;;  %s3039_s19 = scalar_lea.vmem %s305_s17, 32 }
  0x5d   : > { %p3033_p13 = scmp.ne.s32.totalorder %s305_s17, %s3032_s18  ;;  %p3040_p3 = scmp.lt.s32.totalorder %s305_s17, %s305_s17 }
  0x5e   : > { %p3041_p10 = scmp.lt.s32.totalorder %s3039_s19, %s3032_s18 }
  0x5f   : > { %p3035_p0 = pnand %p3033_p13, %p2917_p8 }
  0x60   : > { %p3042_p12 = por %p3041_p10, %p3040_p3 }
  0x61   : > { %p3036_p2 = pneg %p3035_p0 }
  0x63   : > { %p3043_p1 = pnand %p3042_p12, %p3036_p2 }
  0x65   : > { %3046 = shalt.err (!%p3043_p1)
}
  0x66   : > { %2773 = dma.hbm_to_vmem [thread:$0]  (!%p3312_p7), %s3781_s3, 16, %s305_s17, [#allocation6]  }
  0x67   : > { %s353_s4 = scalar_lea.vmem [#allocation10], %s3356_s26  ;;  %s2510_s10 = sshll.u32 %s3338_s23, 6 }
  0x68   : > { %s362_s24 = sshll.u32 %s353_s4, 4  ;;  %s3420_s18 = scalar_lea.hbm %s3784_s6, %s2510_s10  ;;  %s363_s24 = int_to_ptr.vmem [resolvable:$true] %s362_s24 }
  0x69   : > { %s3060_s19 = scalar_lea.vmem %s363_s24, 16  ;;  %s3196_s21 = smov [#allocation10]  }
  0x6a   : > { %p3061_p8 = scmp.ne.s32.totalorder %s363_s24, %s3060_s19  ;;  %s3065_s20 = sshll.u32 %s3196_s21, 4  ;;  %s3066_s20 = int_to_ptr.vmem [resolvable:$false] %s3065_s20 }
  0x6b   : > { %s3067_s0 = scalar_lea.vmem %s3066_s20, 32  ;;  %p3068_p7 = scmp.lt.s32.totalorder %s363_s24, %s3066_s20 }
  0x6c   : > { %p3063_p4 = pnand %p3061_p8, %p2969_p9  ;;  %p3069_p13 = scmp.lt.s32.totalorder %s3067_s0, %s3060_s19 }
  0x6e   : > { %p3064_p11 = pneg %p3063_p4  ;;  %p3070_p0 = por %p3069_p13, %p3068_p7 }
  0x70   : > { %p3071_p2 = pnand %p3070_p0, %p3064_p11 }
  0x72   : > { %3074 = shalt.err (!%p3071_p2)
}
  0x73   : > { %2783 = dma.hbm_to_vmem [thread:$0]  (!%p3370_p6), %s3405_s7, 16, %s363_s24, %s3379_s22  }
  0x74   : > { %s3817_s23 = sand.u32 1, %s3185_s12   ;;  %s3088_s17 = scalar_lea.vmem %s3391_s27, 128 }
  0x75   : > { %s370_s26 = scalar_lea.sflag [#allocation12], %s3817_s23  ;;  %p3089_p3 = scmp.ne.s32.totalorder %s3391_s27, %s3088_s17 }
  0x76   : > { %s3197_s2 = smov [#allocation11]  }
  0x77   : > { %p3091_p10 = pnand %p3089_p3, %p2969_p9  ;;  %s3093_s30 = sshll.u32 %s3197_s2, 4  ;;  %s3094_s30 = int_to_ptr.vmem [resolvable:$false] %s3093_s30 }
  0x78   : > { %s3095_s4 = scalar_lea.vmem %s3094_s30, 256  ;;  %p3096_p1 = scmp.lt.s32.totalorder %s3391_s27, %s3094_s30 }
  0x79   : > { %p3092_p12 = pneg %p3091_p10  ;;  %p3097_p8 = scmp.lt.s32.totalorder %s3095_s4, %s3088_s17 }
  0x7b   : > { %p3098_p4 = por %p3097_p8, %p3096_p1 }
  0x7d   : > { %p3099_p11 = pnand %p3098_p4, %p3092_p12 }
  0x7f   : > { %3102 = shalt.err (!%p3099_p11)
}
  0x80   : > { %s3198_s10 = smov 512   ;;  %s3199_s22 = smov 4  }
  0x81   : > { %s3818_s7 = smov 64   ;;  %393 = sbr.rel (%p3304_p5) target bundleno = 1283 (0x503), region = 52 }
  0x82   : > { %2786 = dma.hbm_to_vmem [thread:$0]  (!%p3370_p6), %s3420_s18, 128, %s3391_s27, %s370_s26, %s3198_s10, %s3818_s7, %s3199_s22  }
  0x83   : > { %p3819_p9 = scmp.ne.s32.totalorder (!%p3304_p5), %s3804_s14, 0 }
  0x86   : > { %3136 = dma.done.wait (%p3819_p9), [#allocation4], 1024  }
  0x87   : > { %3138 = vsyncadd (%p3819_p9), [#allocation4], 4294966272 }
  0x88   : > { %3140 = dma.done.wait (%p3819_p9), [#allocation6], 80  }
  0x89   : > { %3142 = vsyncadd (%p3819_p9), [#allocation6], 4294967216  ;;  %s3820_s24 = sadd.s32 4294967295, %s3185_s12   ;;  %s3455_s27 = sand.u32 1, %s3161_s28  }
  0x8a   : > { %s407_s25 = sand.u32 1, %s3820_s24   ;;  %s2515_s16 = sshll.u32 %s3455_s27, 10 }
  0x8b   : > { %s408_s11 = scalar_lea.sflag [#allocation9], %s407_s25  ;;  %s3458_s13 = scalar_lea.vmem [#allocation8], %s2515_s16 }
  0x8c   : > { %p3821_p5 = scmp.ne.s32.totalorder %s3805_s15, 0 }
  0x8e   : > { %3144 = dma.done.wait (%p3821_p5), %s408_s11, 16400  }
  0x8f   : > { %3146 = vsyncadd (%p3821_p5), %s408_s11, 4294950896  ;;  %s2516_s18 = sshll.u32 %s3455_s27, 3  ;;  %s419_s19 = scalar_lea.vmem [#allocation10], %s3455_s27 }
  0x90   : > { %s425_s21 = scalar_lea.sflag [#allocation12], %s407_s25  ;;  %s3466_s20 = scalar_lea.vmem [#allocation11], %s2516_s18 }
  0x91   : > { %3148 = dma.done.wait (%p3821_p5), %s425_s21, 128  }
  0x92   : > { %3150 = vsyncadd (%p3821_p5), %s425_s21, 4294967168 }
  0x93   : > { %3152 = dma.done.wait (%p3819_p9), [#allocation12], 16  }
  0x94   : > { %3154 = vsyncadd (%p3819_p9), [#allocation12], 4294967280  ;;  %p480_p6 = scmp.lt.s32.totalorder %s3173_s9, 1  ;;  %s3822_s30 = sld [smem:[#allocation19_spill]] }
  0x96   : > { %s481_s0 = scalar_select %p480_p6, %s3173_s9, 1 }
  0x98   : > { %s2518_s23 = sshll.u32 %s481_s0, 1 }
  0x99   : > { %s3481_s2 = scalar_lea.vmem %s3786_s8, %s2518_s23 }
  0x9a   : > { %p2519_p7 = scmp.ne.s32.totalorder %s3822_s30, 0 }
  0x9b   : > { %s3823_s10 = sld [smem:[#allocation25_spill]] (!%p2519_p7)  ;;  %p1045_p13 = scmp.eq.s32.totalorder (!%p2519_p7), %s3173_s9, 0 }
  0x9c   : > { %488 = sbr.rel (%p2519_p7) target bundleno = 623 (0x26f), region = 84 }
  0xa1   : > { %s3824_s22 = smov %s3823_s10  ;;  %v2875_v0 = vld [vmem:[%s3823_s10 + $0x78] sm:$0xff]   ;;  %v3200_v1 = vmov 0   ;;  %v2901_v23 = vld [vmem:[#allocation3 + $0x4] ss:$16 sps:$4 sm:$0xff]   ;;  %vm731_vm0 = vcmask 64512   ;;  %vm738_vm1 = vcmask 1043456   ;;  %v918_v63 = vlaneseq }
  0xa2   : > { %791 = vmatprep.subr.bf16.mxu1 %v3200_v1  ;;  %v2876_v2 = vld [vmem:[%s3824_s22 + $0xb8] sm:$0xff]   ;;  %2696 = vmatprep.subr.bf16.mxu0 %v2875_v0  ;;  %v2878_v4 = vld [vmem:[%s3824_s22 + $0x70] sm:$0xff]   ;;  %v2881_v7 = vld [vmem:[%s3824_s22 + $0x68] sm:$0xff]   ;;  %s1046_s14 = scalar_select %p1045_p13, 1, 0  ;;  %vm1056_vm2 = vcmask 123904  }
  0xa3   : > { %v2877_v3 = vld [vmem:[%s3824_s22 + $0x38] sm:$0xff]   ;;  %792 = vmatpush1.bf16.msra.mxu1 %v2876_v2  ;;  %v2879_v5 = vld [vmem:[%s3824_s22 + $0xb0] sm:$0xff]   ;;  %v2882_v8 = vld [vmem:[%s3824_s22 + $0xa8] sm:$0xff]   ;;  %774 = vmatprep.mubr.bf16.mxu0 %v2901_v23  ;;  %v919_v0 = vshrl.u32 %v918_v63, 7 }
  0xa4   : > { %2697 = vmatpush3.bf16.msra.mxu0 %v2877_v3  ;;  %793 = vmatprep.subr.bf16.mxu1 %v3200_v1  ;;  %v2880_v6 = vld [vmem:[%s3824_s22 + $0x30] sm:$0xff]   ;;  %v2883_v9 = vld [vmem:[%s3824_s22 + $0x28] sm:$0xff]   ;;  %v2884_v10 = vld [vmem:[%s3824_s22 + $0x60] sm:$0xff]   ;;  %s1047_s7 = scvt.s32.f32 %s1046_s14 }
  0xa5   : > { %2698 = vmatprep.subr.bf16.mxu0 %v2878_v4  ;;  %v2885_v11 = vld [vmem:[%s3824_s22 + $0xa0] sm:$0xff]   ;;  %v2887_v13 = vld [vmem:[%s3824_s22 + $0x58] sm:$0xff]   ;;  %v2890_v16 = vld [vmem:[%s3824_s22 + $0x50] sm:$0xff]   ;;  %v1053_v2 = vsub.s32 0, %v919_v0 }
  0xa6   : > { %v2886_v12 = vld [vmem:[%s3824_s22 + $0x20] sm:$0xff]   ;;  %v2888_v14 = vld [vmem:[%s3824_s22 + $0x98] sm:$0xff]   ;;  %v2891_v17 = vld [vmem:[%s3824_s22 + $0x90] sm:$0xff]   ;;  %v1048_v3 = vstv %s1047_s7 }
  0xa7   : > { %794 = vmatpush1.bf16.msra.mxu1 %v2879_v5  ;;  %v2889_v15 = vld [vmem:[%s3824_s22 + $0x18] sm:$0xff]   ;;  %v2892_v18 = vld [vmem:[%s3824_s22 + $0x10] sm:$0xff]   ;;  %v2893_v19 = vld [vmem:[%s3824_s22 + $0x48] sm:$0xff]  }
  0xa8   : > { %2699 = vmatpush3.bf16.msra.mxu0 %v2880_v6  ;;  %795 = vmatprep.subr.bf16.mxu1 %v3200_v1  ;;  %v2894_v20 = vld [vmem:[%s3824_s22 + $0x88] sm:$0xff]   ;;  %v2896_v22 = vld [vmem:[%s3824_s22 + $0x40] sm:$0xff]   ;;  %v842_v35 = vld [vmem:[#allocation5] sm:$0xf]  ;;  %v3201_v6 = vmov 1966171168  }
  0xa9   : > { %2700 = vmatprep.subr.bf16.mxu0 %v2881_v7  ;;  %v2895_v21 = vld [vmem:[%s3824_s22 + $0x8] sm:$0xff]   ;;  %v2897_v24 = vld [vmem:[%s3824_s22 + $0x80] sm:$0xff]   ;;  %v857_v36 = vsel %vm738_vm1, %v842_v35, 0  ;;  %v916_v7 = vunpack.c.l.s4 %v3201_v6 }
  0xaa   : > { %v2905_v25 = vld [vmem:[#allocation3 + $0xc] ss:$16 sps:$4 sm:$0xff]   ;;  %v2898_v26 = vld [vmem:[%s3824_s22] sm:$0xff]   ;;  %v2903_v31 = vld [vmem:[#allocation3 + $0x8] ss:$16 sps:$4 sm:$0xff]  }
  0xab   : > { %796 = vmatpush1.bf16.msra.mxu1 %v2882_v8  ;;  %v2902_v27 = vld [vmem:[%s3824_s22 + $0xc0] ss:$0 sps:$4 sm:$0xff]   ;;  %2553 = vmatprep.mubr.msk.bf16.mxu1 %vm731_vm0, %v2905_v25  ;;  %v2906_v30 = vld [vmem:[#allocation3 + $0x24] ss:$16 sps:$4 sm:$0xff]   ;;  %v2909_v32 = vld [vmem:[#allocation3 + $0x2c] ss:$16 sps:$4 sm:$0xff]  }
  0xac   : > { %2701 = vmatpush3.bf16.msra.mxu0 %v2883_v9  ;;  %797 = vmatprep.subr.bf16.mxu1 %v3200_v1  ;;  %v2899_v28 = vld [vmem:[#allocation3] ss:$16 sps:$4 sm:$0xff]   ;;  %v740_v29 = vsel %vm738_vm1, %v2902_v27, 0  ;;  %v2911_v34 = vld [vmem:[#allocation3 + $0x28] ss:$16 sps:$4 sm:$0xff]   ;;  %v917_v9 = vunpack.c.0.s8 %v916_v7 }
  0xad   : > { %2702 = vmatprep.subr.bf16.mxu0 %v2884_v10  ;;  %v2908_v33 = vld [vmem:[#allocation3 + $0x20] ss:$16 sps:$4 sm:$0xff]   ;;  %v2555_v8 = vld [vmem:[#allocation7] ss:$0 sm:$0xff] }
  0xaf   : > { %798 = vmatpush1.bf16.msra.mxu1 %v2885_v11 }
  0xb0   : > { %2703 = vmatpush3.bf16.msra.mxu0 %v2886_v12  ;;  %799 = vmatprep.subr.bf16.mxu1 %v3200_v1 }
  0xb1   : > { %2704 = vmatprep.subr.bf16.mxu0 %v2887_v13 }
  0xb3   : > { %800 = vmatpush1.bf16.msra.mxu1 %v2888_v14  ;;  %v920_v14 = vsub.s32 %v917_v9, %v919_v0 }
  0xb4   : > { %2705 = vmatpush3.bf16.msra.mxu0 %v2889_v15  ;;  %801 = vmatprep.subr.bf16.mxu1 %v3200_v1 }
  0xb5   : > { %2706 = vmatprep.subr.bf16.mxu0 %v2890_v16 }
  0xb7   : > { %802 = vmatpush1.bf16.msra.mxu1 %v2891_v17 }
  0xb8   : > { %2707 = vmatpush3.bf16.msra.mxu0 %v2892_v18  ;;  %803 = vmatprep.subr.bf16.mxu1 %v3200_v1 }
  0xb9   : > { %2708 = vmatprep.subr.bf16.mxu0 %v2893_v19 }
  0xbb   : > { %804 = vmatpush1.bf16.msra.mxu1 %v2894_v20 }
  0xbc   : > { %2709 = vmatpush3.bf16.msra.mxu0 %v2895_v21  ;;  %805 = vmatprep.subr.bf16.mxu1 %v3200_v1 }
  0xbd   : > { %2710 = vmatprep.subr.bf16.mxu0 %v2896_v22 }
  0xbf   : > { %806 = vmatpush1.bf16.msra.mxu1 %v2897_v24 }
  0xc0   : > { %2711 = vmatpush3.bf16.msra.mxu0 %v2898_v26  ;;  %821 = vmatprep.subr.bf16.mxu1 %v3200_v1  ;;  %v1044_v1 = vld [vmem:[#allocation13] sm:$0x1] }
  0xc1   : > { %2741 = vmatprep.subr.msk.bf16.mxu0 %vm738_vm1, %v842_v35  ;;  %v1049_v4 = vmul.f32 %v1048_v3, %v1044_v1 }
  0xc3   : > { %775 = vmatmul.mubr.bf16.vlgmr.msra.gmra.mxu0 %v2899_v28  ;;  %822 = vmatpush2.bf16.msra.mxu1 %v740_v29  ;;  %v1054_v5 = vrot.slane %v1049_v4, %v1053_v2 }
  0xc4   : > { %782 = vmatprep.mubr.bf16.mxu0 %v2906_v30  ;;  %2730 = vmatpush3.bf16.msra.mxu0 %v857_v36 }
  0xc5   : > { %1057 = vst.msk [vmem:[%s3481_s2] sm:$0x3] %vm1056_vm2, %v1054_v5 }
  0xc6   : > { %824 = vmatmul.mubr.bf16.vlgmr.msra.gmra.mxu1 %v2903_v31 }
  0xc7   : > { %2554 = vmatprep.mubr.msk.bf16.mxu1 %vm731_vm0, %v2909_v32 }
  0xcb   : > { %783 = vmatmul.mubr.bf16.gmra.mxu0 %v2908_v33 }
  0xce   : > { %832 = vmatmul.mubr.bf16.gmra.mxu1 %v2911_v34 }
 0x183   : > { %v2712_v37 = vpop.f32.mrf.mxu0 }
 0x185   : > { %v2713_v38 = vpop.f32.mrf.mxu0 }
 0x186   : > { %v825_v39 = vpop.f32.mrf.mxu1  ;;  %v2714_v41 = vadd.f32 %v2713_v38, %v2712_v37 }
 0x187   : > { %v2715_v40 = vpop.f32.mrf.mxu0 }
 0x188   : > { %v827_v42 = vpop.f32.mrf.mxu1  ;;  %v826_v47 = vadd.f32 %v2714_v41, %v825_v39 }
 0x189   : > { %v2716_v43 = vpop.f32.mrf.mxu0 }
 0x18a   : > { %v2717_v44 = vadd.f32 %v2716_v43, %v2715_v40  ;;  %v828_v45 = vpop.f32.mrf.mxu1 }
 0x18b   : > { %v2718_v46 = vpop.f32.mrf.mxu0 }
 0x18c   : > { %v829_v48 = vadd.f32 %v2717_v44, %v828_v45  ;;  %v830_v49 = vpop.f32.mrf.mxu1 }
 0x18d   : > { %v2719_v50 = vpop.f32.mrf.mxu0 }
 0x18e   : > { %v840_v51 = vpack.c.bf16 %v829_v48, %v826_v47  ;;  %v833_v52 = vpop.f32.mrf.mxu1  ;;  %v2720_v54 = vadd.f32 %v2719_v50, %v2718_v46 }
 0x18f   : > { %v2721_v53 = vpop.f32.mrf.mxu0 }
 0x190   : > { %v835_v55 = vpop.f32.mrf.mxu1  ;;  %2731 = vmatprep.mubr.msk.bf16.mxu0 %vm731_vm0, %v840_v51  ;;  %v834_v59 = vadd.f32 %v2720_v54, %v833_v52 }
 0x191   : > { %v2722_v56 = vpop.f32.mrf.mxu0 }
 0x192   : > { %v2723_v57 = vadd.f32 %v2722_v56, %v2721_v53  ;;  %v836_v58 = vpop.f32.mrf.mxu1 }
 0x194   : > { %v837_v60 = vadd.f32 %v2723_v57, %v836_v58  ;;  %v838_v61 = vpop.f32.mrf.mxu1 }
 0x196   : > { %v841_v62 = vpack.c.bf16 %v837_v60, %v834_v59 }
 0x198   : > { %2732 = vmatmul.mubr.msk.bf16.vlgmr.msra.gmra.mxu0 %vm731_vm0, %v841_v62 }
 0x258   : > { %v2733_v10 = vpop.f32.mrf.mxu0 }
 0x259   : > { %v902_v11 = vadd.f32 %v2733_v10, %v2555_v8 }
 0x25a   : > { %v893_v12 = vpop.f32.mrf.mxu0 }
 0x25b   : > { %v910_v13 = vmax.f32 %v902_v11, 0.0  ;;  %v894_v15 = vadd.f32 %v2555_v8, %v893_v12 }
 0x25c   : > { %v2734_v16 = vpop.f32.mrf.mxu0 }
 0x25d   : > { %v978_v17 = vpack.c.bf16 %v910_v13, %v910_v13  ;;  %v908_v18 = vmax.f32 %v894_v15, 0.0  ;;  %v905_v19 = vadd.f32 %v2734_v16, %v2555_v8 }
 0x25e   : > { %v896_v20 = vpop.f32.mrf.mxu0 }
 0x25f   : > { %979 = vst [vmem:[#allocation2 + $0x8] sm:$0x1] %v978_v17  ;;  %v987_v21 = vrot.slane %v978_v17, %v920_v14  ;;  %v912_v22 = vpack.c.bf16 %v908_v18, %v908_v18  ;;  %v911_v23 = vmax.f32 %v905_v19, 0.0  ;;  %v897_v24 = vadd.f32 %v2555_v8, %v896_v20 }
 0x261   : > { %v988_v25 = vcombine.high %v987_v21, %v987_v21  ;;  %v995_v26 = vrot.slane %v987_v21, %v920_v14  ;;  %913 = vst [vmem:[#allocation2] sm:$0x1] %v912_v22  ;;  %v921_v27 = vrot.slane %v912_v22, %v920_v14  ;;  %v1011_v28 = vpack.c.bf16 %v911_v23, %v911_v23 }
 0x262   : > { %v909_v29 = vmax.f32 %v897_v24, 0.0 }
 0x263   : > { %v1002_v30 = vrot.slane %v988_v25, %v920_v14  ;;  %2560 = vst.sshfl [vmem:[#allocation2 + $0x9] sm:$0x1 pattern:$0x73625140] %v988_v25  ;;  %v1005_v31 = vcombine.high %v995_v26, %v995_v26  ;;  %v922_v32 = vcombine.high %v921_v27, %v921_v27  ;;  %v929_v33 = vrot.slane %v921_v27, %v920_v14 }
 0x264   : > { %1012 = vst [vmem:[#allocation2 + $0xc] sm:$0x1] %v1011_v28  ;;  %v1020_v34 = vrot.slane %v1011_v28, %v920_v14  ;;  %v945_v35 = vpack.c.bf16 %v909_v29, %v909_v29 }
 0x265   : > { %1007 = vst [vmem:[#allocation2 + $0xa] sm:$0x1] %v1005_v31  ;;  %v1008_v36 = vcombine.high %v1002_v30, %v1002_v30  ;;  %v936_v37 = vrot.slane %v922_v32, %v920_v14  ;;  %2558 = vst.sshfl [vmem:[#allocation2 + $0x1] sm:$0x1 pattern:$0x73625140] %v922_v32  ;;  %v939_v38 = vcombine.high %v929_v33, %v929_v33 }
 0x266   : > { %v1021_v39 = vcombine.high %v1020_v34, %v1020_v34  ;;  %v1028_v40 = vrot.slane %v1020_v34, %v920_v14  ;;  %946 = vst [vmem:[#allocation2 + $0x4] sm:$0x1] %v945_v35  ;;  %v954_v41 = vrot.slane %v945_v35, %v920_v14 }
 0x267   : > { %1010 = vst [vmem:[#allocation2 + $0xb] sm:$0x1] %v1008_v36  ;;  %941 = vst [vmem:[#allocation2 + $0x2] sm:$0x1] %v939_v38  ;;  %v942_v42 = vcombine.high %v936_v37, %v936_v37 }
 0x268   : > { %v1035_v43 = vrot.slane %v1021_v39, %v920_v14  ;;  %2561 = vst.sshfl [vmem:[#allocation2 + $0xd] sm:$0x1 pattern:$0x73625140] %v1021_v39  ;;  %v1038_v44 = vcombine.high %v1028_v40, %v1028_v40  ;;  %v955_v45 = vcombine.high %v954_v41, %v954_v41  ;;  %v962_v46 = vrot.slane %v954_v41, %v920_v14 }
 0x269   : > { %944 = vst [vmem:[#allocation2 + $0x3] sm:$0x1] %v942_v42 }
 0x26a   : > { %1040 = vst [vmem:[#allocation2 + $0xe] sm:$0x1] %v1038_v44  ;;  %v1041_v47 = vcombine.high %v1035_v43, %v1035_v43  ;;  %v969_v48 = vrot.slane %v955_v45, %v920_v14  ;;  %2559 = vst.sshfl [vmem:[#allocation2 + $0x5] sm:$0x1 pattern:$0x73625140] %v955_v45  ;;  %v972_v49 = vcombine.high %v962_v46, %v962_v46 }
 0x26c   : > { %1043 = vst [vmem:[#allocation2 + $0xf] sm:$0x1] %v1041_v47  ;;  %974 = vst [vmem:[#allocation2 + $0x6] sm:$0x1] %v972_v49  ;;  %v975_v50 = vcombine.high %v969_v48, %v969_v48 }
 0x26e   : > { %977 = vst [vmem:[#allocation2 + $0x7] sm:$0x1] %v975_v50 }
 0x26f PF: > { %v1172_v51 = vld [vmem:[%s3458_s13 + $0x380] sm:$0xff]  ;;  %v1173_v53 = vld [vmem:[%s3458_s13 + $0x388] sm:$0xff]  ;;  %v1201_v54 = vlaneseq  ;;  %v3202_v60 = vmov 1966171168   ;;  %vm3204_vm3 = vmmov 0   ;;  %vm2323_vm4 = vcmask 123904  }
 0x270   : > { %v1180_v52 = vld [vmem:[%s3458_s13 + $0x3c0] sm:$0xff]  ;;  %v1181_v56 = vld [vmem:[%s3458_s13 + $0x3c8] sm:$0xff]  ;;  %v1199_v61 = vunpack.c.l.s4 %v3202_v60 }
 0x271   : > { %v2676_v55 = vcombine.high %v1172_v51, %v1180_v52  ;;  %v2675_v57 = vcombine.low %v1172_v51, %v1180_v52  ;;  %v1156_v58 = vld [vmem:[%s3458_s13 + $0x300] sm:$0xff]  ;;  %v2678_v62 = vcombine.high %v1173_v53, %v1181_v56  ;;  %v2677_v63 = vcombine.low %v1173_v53, %v1181_v56  ;;  %v1157_v1 = vld [vmem:[%s3458_s13 + $0x308] sm:$0xff] }
 0x272   : > { %v1164_v59 = vld [vmem:[%s3458_s13 + $0x340] sm:$0xff]  ;;  %v1165_v2 = vld [vmem:[%s3458_s13 + $0x348] sm:$0xff]  ;;  %v1200_v4 = vunpack.c.0.s8 %v1199_v61  ;;  %v1202_v5 = vshrl.u32 %v1201_v54, 7  ;;  %v1174_v61 = vld [vmem:[%s3458_s13 + $0x390] sm:$0xff] }
 0x273   : > { %v2660_v0 = vcombine.high %v1156_v58, %v1164_v59  ;;  %1951 = vmatprep.subr.bf16.mxu0 %v2676_v55  ;;  %v2662_v3 = vcombine.high %v1157_v1, %v1165_v2  ;;  %1991 = vmatprep.subr.bf16.mxu1 %v2678_v62  ;;  %v1140_v6 = vld [vmem:[%s3458_s13 + $0x280] sm:$0xff]  ;;  %v1141_v8 = vld [vmem:[%s3458_s13 + $0x288] sm:$0xff]  ;;  %v2659_v11 = vcombine.low %v1156_v58, %v1164_v59  ;;  %v1182_v62 = vld [vmem:[%s3458_s13 + $0x3d0] sm:$0xff] }
 0x274   : > { %1952 = vmatpush1.bf16.xpose.msra.mxu0 %v2675_v57  ;;  %1992 = vmatpush1.bf16.xpose.msra.mxu1 %v2677_v63  ;;  %v1148_v7 = vld [vmem:[%s3458_s13 + $0x2c0] sm:$0xff]  ;;  %v1149_v9 = vld [vmem:[%s3458_s13 + $0x2c8] sm:$0xff]  ;;  %v3589_v10 = vsub.s32 %v1200_v4, %v1202_v5  ;;  %v2661_v12 = vcombine.low %v1157_v1, %v1165_v2  ;;  %v1175_v63 = vld [vmem:[%s3458_s13 + $0x398] sm:$0xff]  ;;  %v2680_v4 = vcombine.high %v1174_v61, %v1182_v62 }
 0x275   : > { %1953 = vmatprep.subr.bf16.mxu0 %v2660_v0  ;;  %1993 = vmatprep.subr.bf16.mxu1 %v2662_v3  ;;  %v2644_v13 = vcombine.high %v1140_v6, %v1148_v7  ;;  %v2646_v14 = vcombine.high %v1141_v8, %v1149_v9  ;;  %v3591_v15 = vld [vmem:[#allocation2] sm:$0xff]  ;;  %v1124_v18 = vld [vmem:[%s3458_s13 + $0x200] sm:$0xff]  ;;  %v2643_v23 = vcombine.low %v1140_v6, %v1148_v7  ;;  %v1183_v0 = vld [vmem:[%s3458_s13 + $0x3d8] sm:$0xff] }
 0x276   : > { %v3595_v16 = vrot.slane %v3591_v15, %v3589_v10  ;;  %v1132_v19 = vld [vmem:[%s3458_s13 + $0x240] sm:$0xff]  ;;  %v1125_v20 = vld [vmem:[%s3458_s13 + $0x208] sm:$0xff]  ;;  %v2645_v24 = vcombine.low %v1141_v8, %v1149_v9  ;;  %v1197_v60 = vcombine.high %v3591_v15, %v3591_v15  ;;  %v2682_v5 = vcombine.high %v1175_v63, %v1183_v0  ;;  %v1158_v8 = vld [vmem:[%s3458_s13 + $0x310] sm:$0xff] }
 0x277   : > { %v1133_v21 = vld [vmem:[%s3458_s13 + $0x248] sm:$0xff]  ;;  %v2628_v25 = vcombine.high %v1124_v18, %v1132_v19  ;;  %v1108_v28 = vld [vmem:[%s3458_s13 + $0x180] sm:$0xff]  ;;  %v2627_v32 = vcombine.low %v1124_v18, %v1132_v19  ;;  %v1166_v9 = vld [vmem:[%s3458_s13 + $0x350] sm:$0xff]  ;;  %v2679_v15 = vcombine.low %v1174_v61, %v1182_v62 }
 0x278   : > { %v1212_v17 = vcombine.high %v3595_v16, %v3595_v16  ;;  %v2630_v27 = vcombine.high %v1125_v20, %v1133_v21  ;;  %v1116_v29 = vld [vmem:[%s3458_s13 + $0x1c0] sm:$0xff]  ;;  %v1109_v30 = vld [vmem:[%s3458_s13 + $0x188] sm:$0xff]  ;;  %v2629_v33 = vcombine.low %v1125_v20, %v1133_v21  ;;  %v3627_v1 = vrot.slane %v1197_v60, %v3589_v10  ;;  %v1142_v20 = vld [vmem:[%s3458_s13 + $0x290] sm:$0xff] }
 0x279   : > { %v1117_v31 = vld [vmem:[%s3458_s13 + $0x1c8] sm:$0xff]  ;;  %v2612_v34 = vcombine.high %v1108_v28, %v1116_v29  ;;  %v1092_v36 = vld [vmem:[%s3458_s13 + $0x100] sm:$0xff]  ;;  %v2611_v40 = vcombine.low %v1108_v28, %v1116_v29  ;;  %v1220_v7 = vrot.slane %v3595_v16, %v3589_v10  ;;  %v2664_v18 = vcombine.high %v1158_v8, %v1166_v9  ;;  %v1150_v21 = vld [vmem:[%s3458_s13 + $0x2d0] sm:$0xff] }
 0x27a   : > { %v1234_v22 = vrot.slane %v1212_v17, %v3589_v10  ;;  %v2614_v35 = vcombine.high %v1109_v30, %v1117_v31  ;;  %v1100_v37 = vld [vmem:[%s3458_s13 + $0x140] sm:$0xff]  ;;  %v1093_v38 = vld [vmem:[%s3458_s13 + $0x108] sm:$0xff]  ;;  %v2613_v41 = vcombine.low %v1109_v30, %v1117_v31  ;;  %v1213_v6 = vcombine.high %v3627_v1, %v3627_v1  ;;  %v1126_v28 = vld [vmem:[%s3458_s13 + $0x210] sm:$0xff] }
 0x27b   : > { %v1101_v39 = vld [vmem:[%s3458_s13 + $0x148] sm:$0xff]  ;;  %v2596_v42 = vcombine.high %v1092_v36, %v1100_v37  ;;  %v1076_v44 = vld [vmem:[%s3458_s13 + $0x80] sm:$0xff]  ;;  %v2595_v48 = vcombine.low %v1092_v36, %v1100_v37  ;;  %v2681_v17 = vcombine.low %v1175_v63, %v1183_v0  ;;  %v1134_v29 = vld [vmem:[%s3458_s13 + $0x250] sm:$0xff] }
 0x27c   : > { %1954 = vmatpush1.bf16.xpose.msra.mxu0 %v2659_v11  ;;  %1994 = vmatpush1.bf16.xpose.msra.mxu1 %v2661_v12  ;;  %v1244_v26 = vcombine.high %v1234_v22, %v1234_v22  ;;  %v2598_v43 = vcombine.high %v1093_v38, %v1101_v39  ;;  %v1084_v45 = vld [vmem:[%s3458_s13 + $0xc0] sm:$0xff]  ;;  %v1077_v46 = vld [vmem:[%s3458_s13 + $0x88] sm:$0xff]  ;;  %v2597_v49 = vcombine.low %v1093_v38, %v1101_v39  ;;  %v1159_v11 = vld [vmem:[%s3458_s13 + $0x318] sm:$0xff] }
 0x27d   : > { %1955 = vmatprep.subr.bf16.mxu0 %v2644_v13  ;;  %1995 = vmatprep.subr.bf16.mxu1 %v2646_v14  ;;  %v1085_v47 = vld [vmem:[%s3458_s13 + $0xc8] sm:$0xff]  ;;  %v2580_v50 = vcombine.high %v1076_v44, %v1084_v45  ;;  %v1060_v52 = vld [vmem:[%s3458_s13] sm:$0xff]  ;;  %v2579_v56 = vcombine.low %v1076_v44, %v1084_v45  ;;  %v1167_v12 = vld [vmem:[%s3458_s13 + $0x358] sm:$0xff]  ;;  %v1241_v13 = vrot.slane %v1213_v6, %v3589_v10 }
 0x27e   : > { %1983 = vmatprep.mubr.bf16.mxu0 %v1234_v22  ;;  %2023 = vmatprep.mubr.bf16.mxu1 %v1244_v26  ;;  %v2582_v51 = vcombine.high %v1077_v46, %v1085_v47  ;;  %v1068_v53 = vld [vmem:[%s3458_s13 + $0x40] sm:$0xff]  ;;  %v1061_v54 = vld [vmem:[%s3458_s13 + $0x8] sm:$0xff]  ;;  %v2581_v57 = vcombine.low %v1077_v46, %v1085_v47  ;;  %v1242_v14 = vcombine.high %v1220_v7, %v1220_v7  ;;  %v1143_v22 = vld [vmem:[%s3458_s13 + $0x298] sm:$0xff] }
 0x27f   : > { %v1069_v55 = vld [vmem:[%s3458_s13 + $0x48] sm:$0xff]  ;;  %v2564_v58 = vcombine.high %v1060_v52, %v1068_v53  ;;  %v2563_v2 = vcombine.low %v1060_v52, %v1068_v53  ;;  %v2666_v19 = vcombine.high %v1159_v11, %v1167_v12  ;;  %v1245_v16 = vcombine.high %v1241_v13, %v1241_v13  ;;  %v1127_v30 = vld [vmem:[%s3458_s13 + $0x218] sm:$0xff]  ;;  %v1110_v36 = vld [vmem:[%s3458_s13 + $0x190] sm:$0xff] }
 0x280   : > { %v2566_v59 = vcombine.high %v1061_v54, %v1069_v55  ;;  %v2565_v3 = vcombine.low %v1061_v54, %v1069_v55  ;;  %v2648_v26 = vcombine.high %v1142_v20, %v1150_v21  ;;  %v1135_v31 = vld [vmem:[%s3458_s13 + $0x258] sm:$0xff]  ;;  %v1118_v37 = vld [vmem:[%s3458_s13 + $0x1d0] sm:$0xff]  ;;  %v1176_v6 = vld [vmem:[%s3458_s13 + $0x3a0] sm:$0xff] }
 0x281   : > { %v1111_v38 = vld [vmem:[%s3458_s13 + $0x198] sm:$0xff]  ;;  %v1094_v44 = vld [vmem:[%s3458_s13 + $0x110] sm:$0xff] }
 0x282   : > { %v1119_v39 = vld [vmem:[%s3458_s13 + $0x1d8] sm:$0xff]  ;;  %v1102_v45 = vld [vmem:[%s3458_s13 + $0x150] sm:$0xff] }
 0x283   : > { %v1095_v46 = vld [vmem:[%s3458_s13 + $0x118] sm:$0xff]  ;;  %v1078_v52 = vld [vmem:[%s3458_s13 + $0x90] sm:$0xff] }
 0x284   : > { %1956 = vmatpush1.bf16.xpose.msra.mxu0 %v2643_v23  ;;  %1996 = vmatpush1.bf16.xpose.msra.mxu1 %v2645_v24  ;;  %v1151_v23 = vld [vmem:[%s3458_s13 + $0x2d8] sm:$0xff]  ;;  %v2663_v24 = vcombine.low %v1158_v8, %v1166_v9  ;;  %v1086_v53 = vld [vmem:[%s3458_s13 + $0xd0] sm:$0xff]  ;;  %v1177_v8 = vld [vmem:[%s3458_s13 + $0x3a8] sm:$0xff] }
 0x285   : > { %1957 = vmatprep.subr.bf16.mxu0 %v2628_v25  ;;  %1997 = vmatprep.subr.bf16.mxu1 %v2630_v27  ;;  %v2665_v25 = vcombine.low %v1159_v11, %v1167_v12  ;;  %v2650_v27 = vcombine.high %v1143_v22, %v1151_v23  ;;  %v1103_v47 = vld [vmem:[%s3458_s13 + $0x158] sm:$0xff]  ;;  %v1062_v60 = vld [vmem:[%s3458_s13 + $0x10] sm:$0xff]  ;;  %v2583_v0 = vcombine.low %v1078_v52, %v1086_v53  ;;  %v1185_v9 = vld [vmem:[%s3458_s13 + $0x3e8] sm:$0xff] }
 0x286   : > { %v1079_v54 = vld [vmem:[%s3458_s13 + $0x98] sm:$0xff]  ;;  %v1070_v61 = vld [vmem:[%s3458_s13 + $0x50] sm:$0xff] }
 0x287   : > { %v1087_v55 = vld [vmem:[%s3458_s13 + $0xd8] sm:$0xff]  ;;  %v2567_v12 = vcombine.low %v1062_v60, %v1070_v61 }
 0x288   : > { %v1063_v62 = vld [vmem:[%s3458_s13 + $0x18] sm:$0xff] }
 0x289   : > { %v1071_v63 = vld [vmem:[%s3458_s13 + $0x58] sm:$0xff] }
 0x28c   : > { %1958 = vmatpush1.bf16.xpose.msra.mxu0 %v2627_v32  ;;  %1998 = vmatpush1.bf16.xpose.msra.mxu1 %v2629_v33  ;;  %v2647_v32 = vcombine.low %v1142_v20, %v1150_v21  ;;  %v2649_v33 = vcombine.low %v1143_v22, %v1151_v23  ;;  %v1161_v20 = vld [vmem:[%s3458_s13 + $0x328] sm:$0xff] }
 0x28d   : > { %1959 = vmatprep.subr.bf16.mxu0 %v2612_v34  ;;  %1999 = vmatprep.subr.bf16.mxu1 %v2614_v35  ;;  %v2632_v34 = vcombine.high %v1126_v28, %v1134_v29  ;;  %v2634_v35 = vcombine.high %v1127_v30, %v1135_v31  ;;  %v1169_v21 = vld [vmem:[%s3458_s13 + $0x368] sm:$0xff] }
 0x294   : > { %1960 = vmatpush1.bf16.xpose.msra.mxu0 %v2611_v40  ;;  %2000 = vmatpush1.bf16.xpose.msra.mxu1 %v2613_v41  ;;  %v2631_v40 = vcombine.low %v1126_v28, %v1134_v29  ;;  %v2633_v41 = vcombine.low %v1127_v30, %v1135_v31  ;;  %v1144_v28 = vld [vmem:[%s3458_s13 + $0x2a0] sm:$0xff]  ;;  %v1145_v30 = vld [vmem:[%s3458_s13 + $0x2a8] sm:$0xff] }
 0x295   : > { %1961 = vmatprep.subr.bf16.mxu0 %v2596_v42  ;;  %2001 = vmatprep.subr.bf16.mxu1 %v2598_v43  ;;  %v2616_v42 = vcombine.high %v1110_v36, %v1118_v37  ;;  %v2618_v43 = vcombine.high %v1111_v38, %v1119_v39  ;;  %v1152_v29 = vld [vmem:[%s3458_s13 + $0x2e0] sm:$0xff]  ;;  %v1153_v31 = vld [vmem:[%s3458_s13 + $0x2e8] sm:$0xff] }
 0x29c   : > { %1962 = vmatpush1.bf16.xpose.msra.mxu0 %v2595_v48  ;;  %2002 = vmatpush1.bf16.xpose.msra.mxu1 %v2597_v49  ;;  %v2615_v48 = vcombine.low %v1110_v36, %v1118_v37  ;;  %v2617_v49 = vcombine.low %v1111_v38, %v1119_v39  ;;  %v1128_v36 = vld [vmem:[%s3458_s13 + $0x220] sm:$0xff]  ;;  %v1129_v38 = vld [vmem:[%s3458_s13 + $0x228] sm:$0xff] }
 0x29d   : > { %1963 = vmatprep.subr.bf16.mxu0 %v2580_v50  ;;  %2003 = vmatprep.subr.bf16.mxu1 %v2582_v51  ;;  %v2600_v50 = vcombine.high %v1094_v44, %v1102_v45  ;;  %v2602_v51 = vcombine.high %v1095_v46, %v1103_v47  ;;  %v1136_v37 = vld [vmem:[%s3458_s13 + $0x260] sm:$0xff]  ;;  %v1137_v39 = vld [vmem:[%s3458_s13 + $0x268] sm:$0xff] }
 0x2a4   : > { %1964 = vmatpush1.bf16.xpose.msra.mxu0 %v2579_v56  ;;  %2004 = vmatpush1.bf16.xpose.msra.mxu1 %v2581_v57  ;;  %v2599_v56 = vcombine.low %v1094_v44, %v1102_v45  ;;  %v2601_v57 = vcombine.low %v1095_v46, %v1103_v47  ;;  %v1112_v44 = vld [vmem:[%s3458_s13 + $0x1a0] sm:$0xff]  ;;  %v1113_v46 = vld [vmem:[%s3458_s13 + $0x1a8] sm:$0xff] }
 0x2a5   : > { %1965 = vmatprep.subr.bf16.mxu0 %v2564_v58  ;;  %2005 = vmatprep.subr.bf16.mxu1 %v2566_v59  ;;  %v2584_v58 = vcombine.high %v1078_v52, %v1086_v53  ;;  %v2586_v59 = vcombine.high %v1079_v54, %v1087_v55  ;;  %v1120_v45 = vld [vmem:[%s3458_s13 + $0x1e0] sm:$0xff]  ;;  %v1121_v47 = vld [vmem:[%s3458_s13 + $0x1e8] sm:$0xff] }
 0x2a6   : > { %v1096_v52 = vld [vmem:[%s3458_s13 + $0x120] sm:$0xff] }
 0x2a7   : > { %v1104_v53 = vld [vmem:[%s3458_s13 + $0x160] sm:$0xff] }
 0x2ac   : > { %1966 = vmatpush1.bf16.xpose.msra.mxu0 %v2563_v2  ;;  %2006 = vmatpush1.bf16.xpose.msra.mxu1 %v2565_v3  ;;  %v2585_v2 = vcombine.low %v1079_v54, %v1087_v55  ;;  %v2568_v3 = vcombine.high %v1062_v60, %v1070_v61  ;;  %v1097_v54 = vld [vmem:[%s3458_s13 + $0x128] sm:$0xff]  ;;  %v1080_v60 = vld [vmem:[%s3458_s13 + $0xa0] sm:$0xff] }
 0x2ad   : > { %2031 = vmatprep.subr.bf16.mxu0 %v2680_v4  ;;  %2071 = vmatprep.subr.bf16.mxu1 %v2682_v5  ;;  %v2570_v4 = vcombine.high %v1063_v62, %v1071_v63  ;;  %v3662_v5 = vld [vmem:[#allocation2 + $0x8] sm:$0xff]  ;;  %v1105_v55 = vld [vmem:[%s3458_s13 + $0x168] sm:$0xff]  ;;  %v1088_v61 = vld [vmem:[%s3458_s13 + $0xe0] sm:$0xff] }
 0x2ae   : > { %v3670_v11 = vrot.slane %v3662_v5, %v3589_v10 }
 0x2b3   : > { %1984 = vmatmul.mubr.bf16.vlgmr.msra.gmra.mxu0 %v1220_v7  ;;  %2024 = vmatmul.mubr.bf16.vlgmr.msra.gmra.mxu1 %v1242_v14  ;;  %v1184_v7 = vld [vmem:[%s3458_s13 + $0x3e0] sm:$0xff] }
 0x2b4   : > { %2032 = vmatpush1.bf16.xpose.msra.mxu0 %v2679_v15  ;;  %2072 = vmatpush1.bf16.xpose.msra.mxu1 %v2681_v17  ;;  %v2684_v14 = vcombine.high %v1176_v6, %v1184_v7  ;;  %v2686_v15 = vcombine.high %v1177_v8, %v1185_v9  ;;  %v1261_v17 = vcombine.high %v3670_v11, %v3670_v11 }
 0x2b5   : > { %2033 = vmatprep.subr.bf16.mxu0 %v2664_v18  ;;  %2073 = vmatprep.subr.bf16.mxu1 %v2666_v19  ;;  %v1227_v18 = vrot.slane %v3627_v1, %v3589_v10  ;;  %v1160_v19 = vld [vmem:[%s3458_s13 + $0x320] sm:$0xff] }
 0x2b6   : > { %2063 = vmatprep.mubr.bf16.mxu0 %v1241_v13  ;;  %2103 = vmatprep.mubr.bf16.mxu1 %v1245_v16  ;;  %v2569_v13 = vcombine.low %v1063_v62, %v1071_v63  ;;  %v1168_v16 = vld [vmem:[%s3458_s13 + $0x360] sm:$0xff]  ;;  %v1283_v22 = vrot.slane %v1261_v17, %v3589_v10  ;;  %v1081_v62 = vld [vmem:[%s3458_s13 + $0xa8] sm:$0xff]  ;;  %v1246_v17 = vcombine.high %v3662_v5, %v3662_v5 }
 0x2b7   : > { %v1243_v23 = vcombine.high %v1227_v18, %v1227_v18  ;;  %v1089_v63 = vld [vmem:[%s3458_s13 + $0xe8] sm:$0xff] }
 0x2b8   : > { %v1293_v1 = vcombine.high %v1283_v22, %v1283_v22 }
 0x2bc   : > { %2034 = vmatpush1.bf16.xpose.msra.mxu0 %v2663_v24  ;;  %2074 = vmatpush1.bf16.xpose.msra.mxu1 %v2665_v25  ;;  %v2683_v24 = vcombine.low %v1176_v6, %v1184_v7  ;;  %v2685_v25 = vcombine.low %v1177_v8, %v1185_v9  ;;  %v1064_v6 = vld [vmem:[%s3458_s13 + $0x20] sm:$0xff]  ;;  %v1065_v8 = vld [vmem:[%s3458_s13 + $0x28] sm:$0xff] }
 0x2bd   : > { %2035 = vmatprep.subr.bf16.mxu0 %v2648_v26  ;;  %2075 = vmatprep.subr.bf16.mxu1 %v2650_v27  ;;  %v2668_v26 = vcombine.high %v1160_v19, %v1168_v16  ;;  %v2670_v27 = vcombine.high %v1161_v20, %v1169_v21  ;;  %v1072_v7 = vld [vmem:[%s3458_s13 + $0x60] sm:$0xff]  ;;  %v1073_v9 = vld [vmem:[%s3458_s13 + $0x68] sm:$0xff] }
 0x2c4   : > { %2036 = vmatpush1.bf16.xpose.msra.mxu0 %v2647_v32  ;;  %2076 = vmatpush1.bf16.xpose.msra.mxu1 %v2649_v33  ;;  %v2667_v32 = vcombine.low %v1160_v19, %v1168_v16  ;;  %v2669_v33 = vcombine.low %v1161_v20, %v1169_v21  ;;  %v1186_v19 = vld [vmem:[%s3458_s13 + $0x3f0] sm:$0xff]  ;;  %v1179_v16 = vld [vmem:[%s3458_s13 + $0x3b8] sm:$0xff]  ;;  %v3712_v21 = vrot.slane %v1246_v17, %v3589_v10 }
 0x2c5   : > { %2037 = vmatprep.subr.bf16.mxu0 %v2632_v34  ;;  %2077 = vmatprep.subr.bf16.mxu1 %v2634_v35  ;;  %v2652_v34 = vcombine.high %v1144_v28, %v1152_v29  ;;  %v2654_v35 = vcombine.high %v1145_v30, %v1153_v31  ;;  %v1187_v20 = vld [vmem:[%s3458_s13 + $0x3f8] sm:$0xff]  ;;  %v1066_v17 = vld [vmem:[%s3458_s13 + $0x30] sm:$0xff] }
 0x2c6   : > { %v1262_v5 = vcombine.high %v3712_v21, %v3712_v21 }
 0x2cc   : > { %2038 = vmatpush1.bf16.xpose.msra.mxu0 %v2631_v40  ;;  %2078 = vmatpush1.bf16.xpose.msra.mxu1 %v2633_v41  ;;  %v2651_v40 = vcombine.low %v1144_v28, %v1152_v29  ;;  %v2653_v41 = vcombine.low %v1145_v30, %v1153_v31  ;;  %v1163_v28 = vld [vmem:[%s3458_s13 + $0x338] sm:$0xff]  ;;  %v1290_v30 = vrot.slane %v1262_v5, %v3589_v10 }
 0x2cd   : > { %2039 = vmatprep.subr.bf16.mxu0 %v2616_v42  ;;  %2079 = vmatprep.subr.bf16.mxu1 %v2618_v43  ;;  %v2636_v42 = vcombine.high %v1128_v36, %v1136_v37  ;;  %v2638_v43 = vcombine.high %v1129_v38, %v1137_v39  ;;  %v1171_v29 = vld [vmem:[%s3458_s13 + $0x378] sm:$0xff] }
 0x2d4   : > { %2040 = vmatpush1.bf16.xpose.msra.mxu0 %v2615_v48  ;;  %2080 = vmatpush1.bf16.xpose.msra.mxu1 %v2617_v49  ;;  %v2635_v48 = vcombine.low %v1128_v36, %v1136_v37  ;;  %v2637_v49 = vcombine.low %v1129_v38, %v1137_v39  ;;  %v1146_v36 = vld [vmem:[%s3458_s13 + $0x2b0] sm:$0xff]  ;;  %v1147_v38 = vld [vmem:[%s3458_s13 + $0x2b8] sm:$0xff] }
 0x2d5   : > { %2041 = vmatprep.subr.bf16.mxu0 %v2600_v50  ;;  %2081 = vmatprep.subr.bf16.mxu1 %v2602_v51  ;;  %v2620_v50 = vcombine.high %v1112_v44, %v1120_v45  ;;  %v2622_v51 = vcombine.high %v1113_v46, %v1121_v47  ;;  %v1154_v37 = vld [vmem:[%s3458_s13 + $0x2f0] sm:$0xff]  ;;  %v1155_v39 = vld [vmem:[%s3458_s13 + $0x2f8] sm:$0xff] }
 0x2dc   : > { %2042 = vmatpush1.bf16.xpose.msra.mxu0 %v2599_v56  ;;  %2082 = vmatpush1.bf16.xpose.msra.mxu1 %v2601_v57  ;;  %v2619_v56 = vcombine.low %v1112_v44, %v1120_v45  ;;  %v2621_v57 = vcombine.low %v1113_v46, %v1121_v47  ;;  %v1130_v44 = vld [vmem:[%s3458_s13 + $0x230] sm:$0xff]  ;;  %v1131_v46 = vld [vmem:[%s3458_s13 + $0x238] sm:$0xff] }
 0x2dd   : > { %2043 = vmatprep.subr.bf16.mxu0 %v2584_v58  ;;  %2083 = vmatprep.subr.bf16.mxu1 %v2586_v59  ;;  %v2604_v58 = vcombine.high %v1096_v52, %v1104_v53  ;;  %v2606_v59 = vcombine.high %v1097_v54, %v1105_v55  ;;  %v1138_v45 = vld [vmem:[%s3458_s13 + $0x270] sm:$0xff]  ;;  %v1139_v47 = vld [vmem:[%s3458_s13 + $0x278] sm:$0xff] }
 0x2e4   : > { %2044 = vmatpush1.bf16.xpose.msra.mxu0 %v2583_v0  ;;  %2084 = vmatpush1.bf16.xpose.msra.mxu1 %v2585_v2  ;;  %v2603_v0 = vcombine.low %v1096_v52, %v1104_v53  ;;  %v2605_v2 = vcombine.low %v1097_v54, %v1105_v55  ;;  %v1114_v52 = vld [vmem:[%s3458_s13 + $0x1b0] sm:$0xff]  ;;  %v1115_v54 = vld [vmem:[%s3458_s13 + $0x1b8] sm:$0xff] }
 0x2e5   : > { %2045 = vmatprep.subr.bf16.mxu0 %v2568_v3  ;;  %2085 = vmatprep.subr.bf16.mxu1 %v2570_v4  ;;  %v2588_v3 = vcombine.high %v1080_v60, %v1088_v61  ;;  %v2590_v4 = vcombine.high %v1081_v62, %v1089_v63  ;;  %v1122_v53 = vld [vmem:[%s3458_s13 + $0x1f0] sm:$0xff]  ;;  %v1123_v55 = vld [vmem:[%s3458_s13 + $0x1f8] sm:$0xff] }
 0x2ec   : > { %2046 = vmatpush1.bf16.xpose.msra.mxu0 %v2567_v12  ;;  %2086 = vmatpush1.bf16.xpose.msra.mxu1 %v2569_v13  ;;  %v2587_v12 = vcombine.low %v1080_v60, %v1088_v61  ;;  %v2589_v13 = vcombine.low %v1081_v62, %v1089_v63  ;;  %v1098_v60 = vld [vmem:[%s3458_s13 + $0x130] sm:$0xff]  ;;  %v1099_v62 = vld [vmem:[%s3458_s13 + $0x138] sm:$0xff] }
 0x2ed   : > { %2111 = vmatprep.subr.bf16.mxu0 %v2684_v14  ;;  %2151 = vmatprep.subr.bf16.mxu1 %v2686_v15  ;;  %v2572_v14 = vcombine.high %v1064_v6, %v1072_v7  ;;  %v2574_v15 = vcombine.high %v1065_v8, %v1073_v9  ;;  %v1106_v61 = vld [vmem:[%s3458_s13 + $0x170] sm:$0xff]  ;;  %v1107_v63 = vld [vmem:[%s3458_s13 + $0x178] sm:$0xff] }
 0x2f3   : > { %2064 = vmatmul.mubr.bf16.vlgmr.msra.gmra.mxu0 %v1227_v18  ;;  %2104 = vmatmul.mubr.bf16.vlgmr.msra.gmra.mxu1 %v1243_v23  ;;  %v1178_v18 = vld [vmem:[%s3458_s13 + $0x3b0] sm:$0xff]  ;;  %v2573_v23 = vcombine.low %v1065_v8, %v1073_v9  ;;  %v1083_v8 = vld [vmem:[%s3458_s13 + $0xb8] sm:$0xff] }
 0x2f4   : > { %2112 = vmatpush1.bf16.xpose.msra.mxu0 %v2683_v24  ;;  %2152 = vmatpush1.bf16.xpose.msra.mxu1 %v2685_v25  ;;  %v2688_v24 = vcombine.high %v1178_v18, %v1186_v19  ;;  %v2690_v25 = vcombine.high %v1179_v16, %v1187_v20  ;;  %v1091_v9 = vld [vmem:[%s3458_s13 + $0xf8] sm:$0xff] }
 0x2f5   : > { %2113 = vmatprep.subr.bf16.mxu0 %v2668_v26  ;;  %2153 = vmatprep.subr.bf16.mxu1 %v2670_v27  ;;  %v1269_v26 = vrot.slane %v3670_v11, %v3589_v10  ;;  %v1162_v27 = vld [vmem:[%s3458_s13 + $0x330] sm:$0xff]  ;;  %v1294_v11 = vcombine.high %v1290_v30, %v1290_v30 }
 0x2f6   : > { %2143 = vmatprep.mubr.bf16.mxu0 %v1283_v22  ;;  %2183 = vmatprep.mubr.bf16.mxu1 %v1293_v1  ;;  %v2571_v22 = vcombine.low %v1064_v6, %v1072_v7  ;;  %v1170_v1 = vld [vmem:[%s3458_s13 + $0x370] sm:$0xff] }
 0x2f7   : > { %v1291_v31 = vcombine.high %v1269_v26, %v1269_v26  ;;  %v1082_v6 = vld [vmem:[%s3458_s13 + $0xb0] sm:$0xff] }
 0x2f8   : > { %v1090_v7 = vld [vmem:[%s3458_s13 + $0xf0] sm:$0xff] }
 0x2fc   : > { %2114 = vmatpush1.bf16.xpose.msra.mxu0 %v2667_v32  ;;  %2154 = vmatpush1.bf16.xpose.msra.mxu1 %v2669_v33  ;;  %v2687_v32 = vcombine.low %v1178_v18, %v1186_v19  ;;  %v2689_v33 = vcombine.low %v1179_v16, %v1187_v20  ;;  %v1074_v18 = vld [vmem:[%s3458_s13 + $0x70] sm:$0xff]  ;;  %v1067_v19 = vld [vmem:[%s3458_s13 + $0x38] sm:$0xff]  ;;  %v2591_v20 = vcombine.low %v1082_v6, %v1090_v7 }
 0x2fd   : > { %2115 = vmatprep.subr.bf16.mxu0 %v2652_v34  ;;  %2155 = vmatprep.subr.bf16.mxu1 %v2654_v35  ;;  %v2672_v34 = vcombine.high %v1162_v27, %v1170_v1  ;;  %v2674_v35 = vcombine.high %v1163_v28, %v1171_v29  ;;  %v1075_v16 = vld [vmem:[%s3458_s13 + $0x78] sm:$0xff] }
 0x2fe   : > { %v2577_v5 = vcombine.low %v1067_v19, %v1075_v16 }
 0x304   : > { %2116 = vmatpush1.bf16.xpose.msra.mxu0 %v2651_v40  ;;  %2156 = vmatpush1.bf16.xpose.msra.mxu1 %v2653_v41  ;;  %v2671_v40 = vcombine.low %v1162_v27, %v1170_v1  ;;  %v2673_v41 = vcombine.low %v1163_v28, %v1171_v29  ;;  %v2562_v1 = vld [vmem:[%s419_s19] ss:$0 sm:$0xff] }
 0x305   : > { %2117 = vmatprep.subr.bf16.mxu0 %v2636_v42  ;;  %2157 = vmatprep.subr.bf16.mxu1 %v2638_v43  ;;  %v2656_v42 = vcombine.high %v1146_v36, %v1154_v37  ;;  %v2658_v43 = vcombine.high %v1147_v38, %v1155_v39 }
 0x30c   : > { %2118 = vmatpush1.bf16.xpose.msra.mxu0 %v2635_v48  ;;  %2158 = vmatpush1.bf16.xpose.msra.mxu1 %v2637_v49  ;;  %v2655_v48 = vcombine.low %v1146_v36, %v1154_v37  ;;  %v2657_v49 = vcombine.low %v1147_v38, %v1155_v39 }
 0x30d   : > { %2119 = vmatprep.subr.bf16.mxu0 %v2620_v50  ;;  %2159 = vmatprep.subr.bf16.mxu1 %v2622_v51  ;;  %v2640_v50 = vcombine.high %v1130_v44, %v1138_v45  ;;  %v2642_v51 = vcombine.high %v1131_v46, %v1139_v47 }
 0x314   : > { %2120 = vmatpush1.bf16.xpose.msra.mxu0 %v2619_v56  ;;  %2160 = vmatpush1.bf16.xpose.msra.mxu1 %v2621_v57  ;;  %v2639_v56 = vcombine.low %v1130_v44, %v1138_v45  ;;  %v2641_v57 = vcombine.low %v1131_v46, %v1139_v47 }
 0x315   : > { %2121 = vmatprep.subr.bf16.mxu0 %v2604_v58  ;;  %2161 = vmatprep.subr.bf16.mxu1 %v2606_v59  ;;  %v2624_v58 = vcombine.high %v1114_v52, %v1122_v53  ;;  %v2626_v59 = vcombine.high %v1115_v54, %v1123_v55 }
 0x31c   : > { %2122 = vmatpush1.bf16.xpose.msra.mxu0 %v2603_v0  ;;  %2162 = vmatpush1.bf16.xpose.msra.mxu1 %v2605_v2  ;;  %v2623_v0 = vcombine.low %v1114_v52, %v1122_v53  ;;  %v2625_v2 = vcombine.low %v1115_v54, %v1123_v55 }
 0x31d   : > { %2123 = vmatprep.subr.bf16.mxu0 %v2588_v3  ;;  %2163 = vmatprep.subr.bf16.mxu1 %v2590_v4  ;;  %v2608_v3 = vcombine.high %v1098_v60, %v1106_v61  ;;  %v2610_v4 = vcombine.high %v1099_v62, %v1107_v63 }
 0x324   : > { %2124 = vmatpush1.bf16.xpose.msra.mxu0 %v2587_v12  ;;  %2164 = vmatpush1.bf16.xpose.msra.mxu1 %v2589_v13  ;;  %v2607_v12 = vcombine.low %v1098_v60, %v1106_v61  ;;  %v2609_v13 = vcombine.low %v1099_v62, %v1107_v63 }
 0x325   : > { %2125 = vmatprep.subr.bf16.mxu0 %v2572_v14  ;;  %2165 = vmatprep.subr.bf16.mxu1 %v2574_v15  ;;  %v2592_v14 = vcombine.high %v1082_v6, %v1090_v7  ;;  %v2594_v15 = vcombine.high %v1083_v8, %v1091_v9  ;;  %v2321_v7 = vld [vmem:[%s3481_s2] sm:$0x3] }
 0x32c   : > { %2126 = vmatpush1.bf16.xpose.msra.mxu0 %v2571_v22  ;;  %2166 = vmatpush1.bf16.xpose.msra.mxu1 %v2573_v23  ;;  %v2593_v22 = vcombine.low %v1083_v8, %v1091_v9  ;;  %v2576_v23 = vcombine.high %v1066_v17, %v1074_v18 }
 0x32d   : > { %2191 = vmatprep.subr.bf16.mxu0 %v2688_v24  ;;  %2231 = vmatprep.subr.bf16.mxu1 %v2690_v25  ;;  %v2578_v24 = vcombine.high %v1067_v19, %v1075_v16  ;;  %v2575_v25 = vcombine.low %v1066_v17, %v1074_v18 }
 0x333   : > { %2144 = vmatmul.mubr.bf16.vlgmr.msra.gmra.mxu0 %v1269_v26  ;;  %2184 = vmatmul.mubr.bf16.vlgmr.msra.gmra.mxu1 %v1291_v31  ;;  %v1276_v26 = vrot.slane %v3712_v21, %v3589_v10  ;;  %v2914_v21 = vld [vmem:[%s3466_s20] sm:$0xff]  }
 0x334   : > { %2192 = vmatpush1.bf16.xpose.msra.mxu0 %v2687_v32  ;;  %2232 = vmatpush1.bf16.xpose.msra.mxu1 %v2689_v33 }
 0x335   : > { %2193 = vmatprep.subr.bf16.mxu0 %v2672_v34  ;;  %2233 = vmatprep.subr.bf16.mxu1 %v2674_v35  ;;  %v1292_v27 = vcombine.high %v1276_v26, %v1276_v26 }
 0x336   : > { %2223 = vmatprep.mubr.bf16.mxu0 %v1290_v30  ;;  %2263 = vmatprep.mubr.bf16.mxu1 %v1294_v11 }
 0x33c   : > { %2194 = vmatpush1.bf16.xpose.msra.mxu0 %v2671_v40  ;;  %2234 = vmatpush1.bf16.xpose.msra.mxu1 %v2673_v41  ;;  %v3203_v40 = vmov 0.0  }
 0x33d   : > { %2195 = vmatprep.subr.bf16.mxu0 %v2656_v42  ;;  %2235 = vmatprep.subr.bf16.mxu1 %v2658_v43 }
 0x344   : > { %2196 = vmatpush1.bf16.xpose.msra.mxu0 %v2655_v48  ;;  %2236 = vmatpush1.bf16.xpose.msra.mxu1 %v2657_v49 }
 0x345   : > { %2197 = vmatprep.subr.bf16.mxu0 %v2640_v50  ;;  %2237 = vmatprep.subr.bf16.mxu1 %v2642_v51 }
 0x34c   : > { %2198 = vmatpush1.bf16.xpose.msra.mxu0 %v2639_v56  ;;  %2238 = vmatpush1.bf16.xpose.msra.mxu1 %v2641_v57 }
 0x34d   : > { %2199 = vmatprep.subr.bf16.mxu0 %v2624_v58  ;;  %2239 = vmatprep.subr.bf16.mxu1 %v2626_v59 }
 0x354   : > { %2200 = vmatpush1.bf16.xpose.msra.mxu0 %v2623_v0  ;;  %2240 = vmatpush1.bf16.xpose.msra.mxu1 %v2625_v2 }
 0x355   : > { %2201 = vmatprep.subr.bf16.mxu0 %v2608_v3  ;;  %2241 = vmatprep.subr.bf16.mxu1 %v2610_v4 }
 0x35c   : > { %2202 = vmatpush1.bf16.xpose.msra.mxu0 %v2607_v12  ;;  %2242 = vmatpush1.bf16.xpose.msra.mxu1 %v2609_v13 }
 0x35d   : > { %2203 = vmatprep.subr.bf16.mxu0 %v2592_v14  ;;  %2243 = vmatprep.subr.bf16.mxu1 %v2594_v15 }
 0x364   : > { %2204 = vmatpush1.bf16.xpose.msra.mxu0 %v2591_v20  ;;  %2244 = vmatpush1.bf16.xpose.msra.mxu1 %v2593_v22 }
 0x365   : > { %2205 = vmatprep.subr.bf16.mxu0 %v2576_v23  ;;  %2245 = vmatprep.subr.bf16.mxu1 %v2578_v24 }
 0x36c   : > { %2206 = vmatpush1.bf16.xpose.msra.mxu0 %v2575_v25  ;;  %2246 = vmatpush1.bf16.xpose.msra.mxu1 %v2577_v5 }
 0x36d   : > { %2735 = vmatprep.subr.bf16.mxu0 %v3203_v40 }
 0x373   : > { %v1985_v28 = vpop.f32.mrf.mxu0  ;;  %2224 = vmatmul.mubr.bf16.vlgmr.msra.gmra.mxu0 %v1276_v26  ;;  %v2025_v30 = vpop.f32.mrf.mxu1  ;;  %2264 = vmatmul.mubr.bf16.vlgmr.msra.gmra.mxu1 %v1292_v27 }
 0x374   : > { %v1986_v29 = vadd.f32 %v2562_v1, %v1985_v28  ;;  %2736 = vmatpush3.bf16.xpose.msra.mxu0 %v2914_v21  ;;  %2737 = vmatprep.mubr.msk.bf16.mxu0 %vm3204_vm3, %v3203_v40 }
 0x375   : > { %v1987_v31 = vpop.f32.mrf.mxu0  ;;  %v2027_v33 = vpop.f32.mrf.mxu1 }
 0x376   : > { %v2026_v32 = vadd.f32 %v2025_v30, %v1986_v29 }
 0x377   : > { %v1988_v34 = vpop.f32.mrf.mxu0  ;;  %v2028_v35 = vpop.f32.mrf.mxu1 }
 0x379   : > { %v1989_v11 = vpop.f32.mrf.mxu0  ;;  %v2029_v36 = vpop.f32.mrf.mxu1 }
 0x3b3   : > { %v2065_v37 = vpop.f32.mrf.mxu0  ;;  %v2105_v10 = vpop.f32.mrf.mxu1 }
 0x3b4   : > { %v2066_v38 = vadd.f32 %v2065_v37, %v2026_v32 }
 0x3b5   : > { %v2067_v39 = vpop.f32.mrf.mxu0  ;;  %v2107_v42 = vpop.f32.mrf.mxu1 }
 0x3b6   : > { %v2106_v41 = vadd.f32 %v2105_v10, %v2066_v38 }
 0x3b7   : > { %v2068_v43 = vpop.f32.mrf.mxu0  ;;  %v2108_v44 = vpop.f32.mrf.mxu1 }
 0x3b9   : > { %v2069_v45 = vpop.f32.mrf.mxu0  ;;  %v2109_v46 = vpop.f32.mrf.mxu1 }
 0x3f3   : > { %v2145_v47 = vpop.f32.mrf.mxu0  ;;  %v2185_v48 = vpop.f32.mrf.mxu1 }
 0x3f4   : > { %v2146_v55 = vadd.f32 %v2145_v47, %v2106_v41 }
 0x3f5   : > { %v2147_v49 = vpop.f32.mrf.mxu0  ;;  %v2187_v50 = vpop.f32.mrf.mxu1 }
 0x3f6   : > { %v2186_v56 = vadd.f32 %v2185_v48, %v2146_v55 }
 0x3f7   : > { %v2148_v51 = vpop.f32.mrf.mxu0  ;;  %v2188_v52 = vpop.f32.mrf.mxu1 }
 0x3f9   : > { %v2149_v53 = vpop.f32.mrf.mxu0  ;;  %v2189_v54 = vpop.f32.mrf.mxu1 }
 0x433   : > { %v2225_v57 = vpop.f32.mrf.mxu0  ;;  %v2265_v59 = vpop.f32.mrf.mxu1 }
 0x434   : > { %v2226_v58 = vadd.f32 %v2225_v57, %v2186_v56 }
 0x435   : > { %v2227_v60 = vpop.f32.mrf.mxu0  ;;  %v2267_v62 = vpop.f32.mrf.mxu1 }
 0x436   : > { %v2266_v61 = vadd.f32 %v2265_v59, %v2226_v58 }
 0x437   : > { %v2228_v63 = vpop.f32.mrf.mxu0  ;;  %v2268_v2 = vpop.f32.mrf.mxu1 }
 0x438   : > { %v2271_v0 = vmax.f32 %v2266_v61, 0.0 }
 0x439   : > { %v2229_v3 = vpop.f32.mrf.mxu0  ;;  %v2269_v6 = vpop.f32.mrf.mxu1 }
 0x43a   : > { %v2272_v4 = vpack.c.bf16 %v2271_v0, %v2271_v0 }
 0x43c   : > { %2738 = vmatmul.mubr.bf16.vlgmr.msra.gmra.mxu0 %v2272_v4 }
 0x4fc   : > { %v2315_v8 = vpop.f32.mrf.mxu0 }
 0x4fd   : > { %v2322_v9 = vadd.f32 %v2321_v7, %v2315_v8 }
 0x4fe   : > { %v2739_v12 = vpop.f32.mrf.mxu0 }
 0x4ff   : > { %2324 = vst.msk [vmem:[%s3481_s2] sm:$0x3] %vm2323_vm4, %v2322_v9 }
 0x500   : > { %v2318_v13 = vpop.f32.mrf.mxu0 }
 0x502   : > { %v2740_v14 = vpop.f32.mrf.mxu0 }
 0x503 PF: > { %s26_s12 = sadd.s32 1, %s3185_s12   ;;  %s3825_s9 = sld [smem:[#allocation24_spill]] }
 0x504   : > { %p23_p0 = scmp.ge.s32.totalorder %s26_s12, 10   ;;  %s3826_s30 = sld [smem:[#allocation20_spill]] }
 0x505   : > { %s3827_s13 = sld [smem:[#allocation21_spill]]  ;;  %s3830_s27 = smov %s3161_s28 }
 0x506   : > { %s3828_s10 = sld [smem:[#allocation22_spill]]  ;;  %s3831_s28 = smov %s3165_s29 }
 0x507   : > { %s3829_s11 = sld [smem:[#allocation23_spill]]  ;;  %25 = sbr.rel (!%p23_p0) target bundleno = 14 (0xe), region = 137 }
 0x509   : > { %s3832_s29 = smov %s3825_s9 }
 0x50b   : > { %s3833_s9 = smov %s3827_s13 }
 0x50c   :  { %2344 = vsyncpa [#allocation4], 1 }
 0x50d   :  { %2346 = vsyncpa [#allocation4 + $0x1], 1 }
 0x50e   :  { %2347 = vsyncpa [#allocation6], 1 }
 0x50f   :  { %2348 = vsyncpa [#allocation9], 1 }
 0x510   :  { %2350 = vsyncpa [#allocation9 + $0x1], 1 }
 0x511   :  { %2351 = vsyncpa [#allocation12], 1 }
 0x512   :  { %2353 = vsyncpa [#allocation12 + $0x1], 1 }

</bundles_post_ra>
